<compile_context>
chip_gen: v5e
topology: v5e:2x2
jax: 0.10.0
libtpu: 0.0.40
codegen_flags: <defaults>
</compile_context>

<pallas_src>
import jax
import jax.numpy as jnp
from jax.experimental import pallas as pl
from jax.experimental.pallas import tpu as pltpu


# ----------------------------- Pallas kernels ------------------------------ #

def _gemm_bias_relu_kernel(x_ref, w_ref, b_ref, o_ref):
    # bf16 operands on the MXU, f32 accumulation, f32 epilogue on the VPU.
    x = x_ref[...].astype(jnp.bfloat16)
    acc = jnp.dot(x, w_ref[...], preferred_element_type=jnp.float32)
    o_ref[...] = jnp.maximum(acc + b_ref[...], 0.0).astype(o_ref.dtype)


def _pick_tile_m(m):
    """Largest tile <= 128 that divides M and is a multiple of 8, else M."""
    if m % 8 == 0 and m <= 128:
        return m
    for t in range(128, 7, -8):
        if m % t == 0:
            return t
    return m  # single full-extent block


def gemm_bias_relu(x, w_t, b2d):
    """relu(x @ w_t + b) via pallas_call.  x:(M,K) f32, w_t:(K,N) bf16."""
    M, K = x.shape
    N = w_t.shape[1]
    tile_m = _pick_tile_m(M)
    return pl.pallas_call(
        _gemm_bias_relu_kernel,
        out_shape=jax.ShapeDtypeStruct((M, N), jnp.float32),
        grid=(M // tile_m,),
        in_specs=[
            pl.BlockSpec((tile_m, K), lambda i: (i, 0)),
            pl.BlockSpec((K, N), lambda i: (0, 0)),
            pl.BlockSpec((1, N), lambda i: (0, 0)),
        ],
        out_specs=pl.BlockSpec((tile_m, N), lambda i: (i, 0)),
        compiler_params=pltpu.CompilerParams(
            dimension_semantics=("parallel",)),
    )(x, w_t, b2d)


def _make_fused_tail_kernel(n_batch, chunk):
    """Fused relu(conv2-GEMM) -> linear -> relu -> fc, one chunk of conv2
    spatial positions per grid step (reduction grid)."""

    def kernel(p_ref, w2_ref, b2_ref, wl_ref, bl_ref, wf_ref, bf_ref,
               o_ref, acc_ref, y_ref):
        step = pl.program_id(0)

        @pl.when(step == 0)
        def _():
            acc_ref[...] = jnp.zeros_like(acc_ref)

        # conv2 GEMM + bias + ReLU for this chunk: (chunk*N, 512) @ (512, 128)
        x = p_ref[...].astype(jnp.bfloat16)
        y = jnp.dot(x, w2_ref[...], preferred_element_type=jnp.float32)
        y_ref[...] = jnp.maximum(y + b2_ref[...], 0.0)      # f32 in VMEM scratch

        # Each spatial position t pairs rows [t*N:(t+1)*N] of y with its own
        # folded linear-weight slab wl_ref[t] (128, 256): accumulate h.
        acc = acc_ref[...]
        for t in range(chunk):
            ys = y_ref[t * n_batch:(t + 1) * n_batch, :].astype(jnp.bfloat16)
            acc = acc + jnp.dot(ys, wl_ref[t],
                                preferred_element_type=jnp.float32)
        acc_ref[...] = acc

        @pl.when(step == pl.num_programs(0) - 1)
        def _():
            h = jnp.maximum(acc + bl_ref[...], 0.0).astype(jnp.bfloat16)
            out = jnp.dot(h, wf_ref[...], preferred_element_type=jnp.float32)
            o_ref[...] = (out + bf_ref[...]).astype(o_ref.dtype)

    return kernel


def _pick_chunk(s, n):
    """Largest chunk <= 8 dividing S with a sublane-aligned (chunk*N) block."""
    for c in range(min(8, s), 0, -1):
        if s % c == 0 and (c * n) % 8 == 0:
            return c
    return s  # fall back to one full-extent block


def conv2_linear_fc(p2s, w2, b2, wl3, bl, wf, bf, n_batch):
    """p2s: conv2 patches, spatial-major rows (s, n).  Streams wl3 over S."""
    _, k2 = p2s.shape
    s_total, c2, p_dim = wl3.shape
    f_dim = wf.shape[1]
    chunk = _pick_chunk(s_total, n_batch)
    n_steps = s_total // chunk
    return pl.pallas_call(
        _make_fused_tail_kernel(n_batch, chunk),
        out_shape=jax.ShapeDtypeStruct((n_batch, f_dim), jnp.float32),
        grid=(n_steps,),
        in_specs=[
            pl.BlockSpec((chunk * n_batch, k2), lambda i: (i, 0)),   # patches
            pl.BlockSpec((k2, c2), lambda i: (0, 0)),                # conv2 w
            pl.BlockSpec((1, c2), lambda i: (0, 0)),                 # conv2 b
            pl.BlockSpec((chunk, c2, p_dim), lambda i: (i, 0, 0)),   # linear w
            pl.BlockSpec((1, p_dim), lambda i: (0, 0)),              # linear b
            pl.BlockSpec((p_dim, f_dim), lambda i: (0, 0)),          # fc w
            pl.BlockSpec((1, f_dim), lambda i: (0, 0)),              # fc b
        ],
        out_specs=pl.BlockSpec((n_batch, f_dim), lambda i: (0, 0)),
        scratch_shapes=[
            pltpu.VMEM((n_batch, p_dim), jnp.float32),               # acc
            pltpu.VMEM((chunk * n_batch, c2), jnp.float32),          # conv2 act
        ],
        compiler_params=pltpu.CompilerParams(
            dimension_semantics=("arbitrary",)),
    )(p2s, w2, b2, wl3, bl, wf, bf)


# ------------------------------- XLA glue ---------------------------------- #
# Pure data rearrangement (zero padding, strided patch extraction); the
# GEMM + bias + ReLU hot path is entirely inside the Pallas kernels.

def zero_pad2d_nchw(x, padding):
    """nn.ZeroPad2d semantics: padding = (left, right, top, bottom), NCHW."""
    left, right, top, bottom = padding
    return jnp.pad(x, ((0, 0), (0, 0), (top, bottom), (left, right)))


def im2col_nchw(x, kh, kw, stride):
    """NCHW -> patches (N*Ho*Wo, C*kh*kw), feature order (c, i, j)."""
    N, C, H, W = x.shape
    Ho = (H - kh) // stride + 1
    Wo = (W - kw) // stride + 1
    cols = []
    for i in range(kh):
        for j in range(kw):
            cols.append(x[:, :, i:i + stride * Ho:stride,
                             j:j + stride * Wo:stride])
    p = jnp.stack(cols, axis=2)                         # (N, C, kh*kw, Ho, Wo)
    p = p.reshape(N, C * kh * kw, Ho, Wo)
    p = p.transpose(0, 2, 3, 1).reshape(N * Ho * Wo, C * kh * kw)
    return p, Ho, Wo


def im2col_nhwc(x, kh, kw, stride):
    """NHWC -> patches (N, Ho, Wo, kh*kw*C), feature order (i, j, c)."""
    N, H, W, C = x.shape
    Ho = (H - kh) // stride + 1
    Wo = (W - kw) // stride + 1
    cols = []
    for i in range(kh):
        for j in range(kw):
            cols.append(x[:, i:i + stride * Ho:stride,
                             j:j + stride * Wo:stride, :])
    p = jnp.stack(cols, axis=3)                         # (N, Ho, Wo, kh*kw, C)
    return p.reshape(N, Ho, Wo, kh * kw * C), Ho, Wo


# --------------------------- parameter handling ----------------------------- #

def init_params(key, lin_in):
    def uniform(k, shape, fan_in):
        bound = 1.0 / float(fan_in) ** 0.5
        return jax.random.uniform(k, shape, jnp.float32, -bound, bound)

    ks = jax.random.split(key, 8)
    return {
        "conv1_w": uniform(ks[0], (32, 3, 5, 5), 3 * 5 * 5),
        "conv1_b": uniform(ks[1], (32,), 3 * 5 * 5),
        "conv2_w": uniform(ks[2], (128, 32, 4, 4), 32 * 4 * 4),
        "conv2_b": uniform(ks[3], (128,), 32 * 4 * 4),
        "linear_w": uniform(ks[4], (250, lin_in), lin_in),   # lazy nn.Linear
        "linear_b": uniform(ks[5], (250,), lin_in),
        "fc_w": uniform(ks[6], (10, 250), 250),
        "fc_b": uniform(ks[7], (10,), 250),
    }


def prepare_params(params, spatial2):
    """One-time (outside jit) weight permute / pad / bf16 cast.

    * conv1 weight: OIHW -> (Cin*kh*kw, Cout), K zero-padded to 128.
    * conv2 weight: OIHW -> (kh*kw*Cin, Cout)  [matches NHWC im2col order].
    * linear weight: the NCHW-flatten (idx = c*S + s) is folded into a
      per-spatial-position slab wl3[s, c, p] = W[p, c*S + s]; hidden dim
      zero-padded 250 -> 256 for lane alignment (fc rows padded with zeros).
    """
    f32 = jnp.float32

    w1 = params["conv1_w"].reshape(params["conv1_w"].shape[0], -1).T  # (75,32)
    k1 = w1.shape[0]
    k1p = ((k1 + 127) // 128) * 128
    w1 = jnp.pad(w1, ((0, k1p - k1), (0, 0))).astype(jnp.bfloat16)    # (128,32)

    co2 = params["conv2_w"].shape[0]
    w2 = (params["conv2_w"].transpose(0, 2, 3, 1)
          .reshape(co2, -1).T.astype(jnp.bfloat16))                   # (512,128)

    nl = params["linear_w"].shape[0]                                  # 250
    p_pad = ((nl + 127) // 128) * 128                                 # 256
    wl3 = (params["linear_w"].reshape(nl, co2, spatial2)
           .transpose(2, 1, 0))                                       # (S,128,250)
    wl3 = jnp.pad(wl3, ((0, 0), (0, 0), (0, p_pad - nl))).astype(jnp.bfloat16)
    bl = jnp.pad(params["linear_b"], (0, p_pad - nl)).reshape(1, -1).astype(f32)

    wf = jnp.pad(params["fc_w"].T,
                 ((0, p_pad - nl), (0, 0))).astype(jnp.bfloat16)      # (256,10)

    return {
        "w1": w1, "b1": params["conv1_b"].reshape(1, -1).astype(f32),
        "w2": w2, "b2": params["conv2_b"].reshape(1, -1).astype(f32),
        "wl3": wl3, "bl": bl,
        "wf": wf, "bf": params["fc_b"].reshape(1, -1).astype(f32),
    }


# ----------------------------- model forward -------------------------------- #

def cnn_4layer_b_forward(prep, x, paddingA, paddingB):
    N = x.shape[0]

    # padA + conv1 (5x5, stride 2, pad 0) + ReLU  -> im2col GEMM on the MXU
    x = zero_pad2d_nchw(x, paddingA)
    p1, H1, W1 = im2col_nchw(x, 5, 5, 2)                   # (N*H1*W1, 75)
    p1 = jnp.pad(p1, ((0, 0), (0, prep["w1"].shape[0] - p1.shape[1])))
    y1 = gemm_bias_relu(p1, prep["w1"], prep["b1"])        # (N*H1*W1, 32)

    # conv1 GEMM rows are (n, h, w) -> this reshape is NHWC and metadata-only.
    x1 = y1.reshape(N, H1, W1, -1)

    # padB + conv2's own padding=1, then NHWC im2col (weight pre-permuted).
    left, right, top, bottom = paddingB
    x1 = jnp.pad(x1, ((0, 0), (top + 1, bottom + 1),
                      (left + 1, right + 1), (0, 0)))
    p2, H2, W2 = im2col_nhwc(x1, 4, 4, 2)                  # (N, H2, W2, 512)

    # Spatial-major (s, n) row order: lets the fused kernel stream chunks of
    # spatial positions and fold the NCHW flatten into per-s weight slabs.
    k2 = p2.shape[-1]
    p2s = p2.transpose(1, 2, 0, 3).reshape(H2 * W2 * N, k2)

    # Fused conv2-GEMM + ReLU + linear + ReLU + fc in a single Pallas kernel.
    return conv2_linear_fc(p2s, prep["w2"], prep["b2"], prep["wl3"],
                           prep["bl"], prep["wf"], prep["bf"], N)


def reference_forward(params, x, paddingA, paddingB):
    """Pure-JAX f32 reference (lax conv) for correctness checking."""
    def conv(x, w, b, stride, padding):
        y = jax.lax.conv_general_dilated(
            x, w, window_strides=(stride, stride),
            padding=((padding, padding), (padding, padding)),
            dimension_numbers=("NCHW", "OIHW", "NCHW"))
        return y + b.reshape(1, -1, 1, 1)

    x = zero_pad2d_nchw(x, paddingA)
    x = jax.nn.relu(conv(x, params["conv1_w"], params["conv1_b"], 2, 0))
    x = zero_pad2d_nchw(x, paddingB)
    x = jax.nn.relu(conv(x, params["conv2_w"], params["conv2_b"], 2, 1))
    x = x.reshape(x.shape[0], -1)
    x = jax.nn.relu(x @ params["linear_w"].T + params["linear_b"])
    return x @ params["fc_w"].T + params["fc_b"]


if __name__ == "__main__":
    # nn.ZeroPad2d tuples: (left, right, top, bottom) -- distinct/asymmetric.
    paddingA = (1, 2, 3, 4)
    paddingB = (2, 1, 4, 3)

    N, C, H, W = 2, 3, 16, 16
    key = jax.random.PRNGKey(0)
    kx, kp = jax.random.split(key)
    x = jax.random.normal(kx, (N, C, H, W), jnp.float32)

    # Resolve the lazily-created nn.Linear input size analytically.
    def conv_out(n, k, s, p):
        return (n + 2 * p - k) // s + 1
    Hp, Wp = H + paddingA[2] + paddingA[3], W + paddingA[0] + paddingA[1]
    H1, W1 = conv_out(Hp, 5, 2, 0), conv_out(Wp, 5, 2, 0)
    H1b, W1b = H1 + paddingB[2] + paddingB[3], W1 + paddingB[0] + paddingB[1]
    H2, W2 = conv_out(H1b, 4, 2, 1), conv_out(W1b, 4, 2, 1)
    lin_in = 128 * H2 * W2

    params = init_params(kp, lin_in)
    prep = prepare_params(params, H2 * W2)   # eager: permute/pad/bf16 once

    fwd = jax.jit(lambda p, xx: cnn_4layer_b_forward(p, xx, paddingA, paddingB))
    out = jax.block_until_ready(fwd(prep, x))

    assert out.shape == (N, 10) and out.dtype == jnp.float32
    ref = reference_forward(params, x, paddingA, paddingB)
    if not bool(jnp.allclose(out, ref, rtol=2e-2, atol=2e-2)):
        raise AssertionError("Pallas output does not match JAX reference")

    print("KERNEL_OK")
</pallas_src>

<mosaic_0001>
module attributes {stable_mosaic.version = 11 : i64} {
  func.func @_gemm_bias_relu_kernel(%arg0: i32, %arg1: memref<80x128xf32, #tpu.memory_space<vmem>>, %arg2: memref<128x32xbf16, #tpu.memory_space<vmem>>, %arg3: memref<1x32xf32, #tpu.memory_space<vmem>>, %arg4: memref<80x32xf32, #tpu.memory_space<vmem>>) attributes {dimension_semantics = [#tpu.dimension_semantics<parallel>], iteration_bounds = array<i64: 2>, scalar_prefetch = 0 : i64, scratch_operands = 0 : i64, tpu.core_type = #tpu.core_type<tc>, window_params = [{transform_indices = @transform_0, window_bounds = array<i64: 80, 128>}, {pipeline_mode = #tpu.pipeline_mode<synchronous>, transform_indices = @transform_1, window_bounds = array<i64: 128, 32>}, {pipeline_mode = #tpu.pipeline_mode<synchronous>, transform_indices = @transform_2, window_bounds = array<i64: 1, 32>}, {transform_indices = @transform_3, window_bounds = array<i64: 80, 32>}]} {
    %c0 = arith.constant 0 : index
    %c0_0 = arith.constant 0 : index
    %0 = vector.load %arg1[%c0, %c0_0] : memref<80x128xf32, #tpu.memory_space<vmem>>, vector<80x128xf32>
    %1 = arith.truncf %0 : vector<80x128xf32> to vector<80x128xbf16>
    %c0_1 = arith.constant 0 : index
    %c0_2 = arith.constant 0 : index
    %2 = vector.load %arg2[%c0_1, %c0_2] : memref<128x32xbf16, #tpu.memory_space<vmem>>, vector<128x32xbf16>
    %cst = arith.constant dense<0.000000e+00> : vector<80x32xf32>
    %3 = tpu.matmul %1, %2, %cst {dimension_numbers = #tpu.dot_dimension_numbers<[1], [0], [0], [1], [0, 0, 1, 1], [], []>} : vector<80x128xbf16>, vector<128x32xbf16>, vector<80x32xf32> -> vector<80x32xf32>
    %c0_3 = arith.constant 0 : index
    %c0_4 = arith.constant 0 : index
    %4 = vector.load %arg3[%c0_3, %c0_4] : memref<1x32xf32, #tpu.memory_space<vmem>>, vector<1x32xf32>
    %5 = vector.broadcast %4 : vector<1x32xf32> to vector<80x32xf32>
    %6 = arith.addf %3, %5 : vector<80x32xf32>
    %cst_5 = arith.constant 0.000000e+00 : f32
    %7 = vector.broadcast %cst_5 : f32 to vector<80x32xf32>
    %8 = arith.maximumf %6, %7 : vector<80x32xf32>
    %c0_6 = arith.constant 0 : index
    %c0_7 = arith.constant 0 : index
    %9 = vector.load %arg4[%c0_6, %c0_7] : memref<80x32xf32, #tpu.memory_space<vmem>>, vector<80x32xf32>
    tpu.vector_store %arg4[%c0_6, %c0_7], %8 {strides = array<i32>} : memref<80x32xf32, #tpu.memory_space<vmem>>, vector<80x32xf32>,
    return
  }
  func.func @transform_0(%arg0: i32) -> (i32, i32) {
    %c0_i32 = arith.constant 0 : i32
    %c0_i32_0 = arith.constant 0 : i32
    return %arg0, %c0_i32 : i32, i32
  }
  func.func @transform_1(%arg0: i32) -> (i32, i32) {
    %c0_i32 = arith.constant 0 : i32
    %c0_i32_0 = arith.constant 0 : i32
    %c0_i32_1 = arith.constant 0 : i32
    return %c0_i32, %c0_i32_0 : i32, i32
  }
  func.func @transform_2(%arg0: i32) -> (i32, i32) {
    %c0_i32 = arith.constant 0 : i32
    %c0_i32_0 = arith.constant 0 : i32
    %c0_i32_1 = arith.constant 0 : i32
    return %c0_i32, %c0_i32_0 : i32, i32
  }
  func.func @transform_3(%arg0: i32) -> (i32, i32) {
    %c0_i32 = arith.constant 0 : i32
    %c0_i32_0 = arith.constant 0 : i32
    return %arg0, %c0_i32 : i32, i32
  }
}

module attributes {stable_mosaic.version = 11 : i64} {
  func.func @kernel(%arg0: i32, %arg1: memref<16x512xf32, #tpu.memory_space<vmem>>, %arg2: memref<512x128xbf16, #tpu.memory_space<vmem>>, %arg3: memref<1x128xf32, #tpu.memory_space<vmem>>, %arg4: memref<8x128x256xbf16, #tpu.memory_space<vmem>>, %arg5: memref<1x256xf32, #tpu.memory_space<vmem>>, %arg6: memref<256x10xbf16, #tpu.memory_space<vmem>>, %arg7: memref<1x10xf32, #tpu.memory_space<vmem>>, %arg8: memref<2x10xf32, #tpu.memory_space<vmem>>, %arg9: memref<2x256xf32, #tpu.memory_space<vmem>>, %arg10: memref<16x128xf32, #tpu.memory_space<vmem>>) attributes {dimension_semantics = [#tpu.dimension_semantics<arbitrary>], iteration_bounds = array<i64: 5>, scalar_prefetch = 0 : i64, scratch_operands = 2 : i64, tpu.core_type = #tpu.core_type<tc>, window_params = [{transform_indices = @transform_0, window_bounds = array<i64: 16, 512>}, {pipeline_mode = #tpu.pipeline_mode<synchronous>, transform_indices = @transform_1, window_bounds = array<i64: 512, 128>}, {pipeline_mode = #tpu.pipeline_mode<synchronous>, transform_indices = @transform_2, window_bounds = array<i64: 1, 128>}, {transform_indices = @transform_3, window_bounds = array<i64: 8, 128, 256>}, {pipeline_mode = #tpu.pipeline_mode<synchronous>, transform_indices = @transform_4, window_bounds = array<i64: 1, 256>}, {pipeline_mode = #tpu.pipeline_mode<synchronous>, transform_indices = @transform_5, window_bounds = array<i64: 256, 10>}, {pipeline_mode = #tpu.pipeline_mode<synchronous>, transform_indices = @transform_6, window_bounds = array<i64: 1, 10>}, {pipeline_mode = #tpu.pipeline_mode<synchronous>, transform_indices = @transform_7, window_bounds = array<i64: 2, 10>}]} {
    %c0_i32 = arith.constant 0 : i32
    %0 = arith.cmpi eq, %arg0, %c0_i32 : i32
    %1 = arith.extui %0 : i1 to i32
    %c0_i32_0 = arith.constant 0 : i32
    %2 = arith.cmpi ne, %1, %c0_i32_0 : i32
    scf.if %2 {
      %cst_51 = arith.constant 0.000000e+00 : f32
      %66 = vector.broadcast %cst_51 : f32 to vector<2x256xf32>
      %c0_52 = arith.constant 0 : index
      %c0_53 = arith.constant 0 : index
      %67 = vector.load %arg9[%c0_52, %c0_53] : memref<2x256xf32, #tpu.memory_space<vmem>>, vector<2x256xf32>
      tpu.vector_store %arg9[%c0_52, %c0_53], %66 {strides = array<i32>} : memref<2x256xf32, #tpu.memory_space<vmem>>, vector<2x256xf32>,
    } else {
    }
    %c0 = arith.constant 0 : index
    %c0_1 = arith.constant 0 : index
    %3 = vector.load %arg1[%c0, %c0_1] : memref<16x512xf32, #tpu.memory_space<vmem>>, vector<16x512xf32>
    %4 = arith.truncf %3 : vector<16x512xf32> to vector<16x512xbf16>
    %c0_2 = arith.constant 0 : index
    %c0_3 = arith.constant 0 : index
    %5 = vector.load %arg2[%c0_2, %c0_3] : memref<512x128xbf16, #tpu.memory_space<vmem>>, vector<512x128xbf16>
    %cst = arith.constant dense<0.000000e+00> : vector<16x128xf32>
    %6 = tpu.matmul %4, %5, %cst {dimension_numbers = #tpu.dot_dimension_numbers<[1], [0], [0], [1], [0, 0, 1, 1], [], []>} : vector<16x512xbf16>, vector<512x128xbf16>, vector<16x128xf32> -> vector<16x128xf32>
    %c0_4 = arith.constant 0 : index
    %c0_5 = arith.constant 0 : index
    %7 = vector.load %arg3[%c0_4, %c0_5] : memref<1x128xf32, #tpu.memory_space<vmem>>, vector<1x128xf32>
    %8 = vector.broadcast %7 : vector<1x128xf32> to vector<16x128xf32>
    %9 = arith.addf %6, %8 : vector<16x128xf32>
    %cst_6 = arith.constant 0.000000e+00 : f32
    %10 = vector.broadcast %cst_6 : f32 to vector<16x128xf32>
    %11 = arith.maximumf %9, %10 : vector<16x128xf32>
    %c0_7 = arith.constant 0 : index
    %c0_8 = arith.constant 0 : index
    %12 = vector.load %arg10[%c0_7, %c0_8] : memref<16x128xf32, #tpu.memory_space<vmem>>, vector<16x128xf32>
    tpu.vector_store %arg10[%c0_7, %c0_8], %11 {strides = array<i32>} : memref<16x128xf32, #tpu.memory_space<vmem>>, vector<16x128xf32>,
    %c0_9 = arith.constant 0 : index
    %c0_10 = arith.constant 0 : index
    %13 = vector.load %arg9[%c0_9, %c0_10] : memref<2x256xf32, #tpu.memory_space<vmem>>, vector<2x256xf32>
    %c0_11 = arith.constant 0 : index
    %c0_12 = arith.constant 0 : index
    %14 = vector.load %arg10[%c0_11, %c0_12] : memref<16x128xf32, #tpu.memory_space<vmem>>, vector<2x128xf32>
    %15 = arith.truncf %14 : vector<2x128xf32> to vector<2x128xbf16>
    %c0_13 = arith.constant 0 : index
    %c0_14 = arith.constant 0 : index
    %c0_15 = arith.constant 0 : index
    %16 = vector.load %arg4[%c0_13, %c0_14, %c0_15] : memref<8x128x256xbf16, #tpu.memory_space<vmem>>, vector<1x128x256xbf16>
    %17 = vector.shape_cast %16 : vector<1x128x256xbf16> to vector<128x256xbf16>
    %cst_16 = arith.constant dense<0.000000e+00> : vector<2x256xf32>
    %18 = tpu.matmul %15, %17, %cst_16 {dimension_numbers = #tpu.dot_dimension_numbers<[1], [0], [0], [1], [0, 0, 1, 1], [], []>} : vector<2x128xbf16>, vector<128x256xbf16>, vector<2x256xf32> -> vector<2x256xf32>
    %19 = arith.addf %13, %18 : vector<2x256xf32>
    %c2 = arith.constant 2 : index
    %c0_17 = arith.constant 0 : index
    %20 = vector.load %arg10[%c2, %c0_17] : memref<16x128xf32, #tpu.memory_space<vmem>>, vector<2x128xf32>
    %21 = arith.truncf %20 : vector<2x128xf32> to vector<2x128xbf16>
    %c1 = arith.constant 1 : index
    %c0_18 = arith.constant 0 : index
    %c0_19 = arith.constant 0 : index
    %22 = vector.load %arg4[%c1, %c0_18, %c0_19] : memref<8x128x256xbf16, #tpu.memory_space<vmem>>, vector<1x128x256xbf16>
    %23 = vector.shape_cast %22 : vector<1x128x256xbf16> to vector<128x256xbf16>
    %cst_20 = arith.constant dense<0.000000e+00> : vector<2x256xf32>
    %24 = tpu.matmul %21, %23, %cst_20 {dimension_numbers = #tpu.dot_dimension_numbers<[1], [0], [0], [1], [0, 0, 1, 1], [], []>} : vector<2x128xbf16>, vector<128x256xbf16>, vector<2x256xf32> -> vector<2x256xf32>
    %25 = arith.addf %19, %24 : vector<2x256xf32>
    %c4 = arith.constant 4 : index
    %c0_21 = arith.constant 0 : index
    %26 = vector.load %arg10[%c4, %c0_21] : memref<16x128xf32, #tpu.memory_space<vmem>>, vector<2x128xf32>
    %27 = arith.truncf %26 : vector<2x128xf32> to vector<2x128xbf16>
    %c2_22 = arith.constant 2 : index
    %c0_23 = arith.constant 0 : index
    %c0_24 = arith.constant 0 : index
    %28 = vector.load %arg4[%c2_22, %c0_23, %c0_24] : memref<8x128x256xbf16, #tpu.memory_space<vmem>>, vector<1x128x256xbf16>
    %29 = vector.shape_cast %28 : vector<1x128x256xbf16> to vector<128x256xbf16>
    %cst_25 = arith.constant dense<0.000000e+00> : vector<2x256xf32>
    %30 = tpu.matmul %27, %29, %cst_25 {dimension_numbers = #tpu.dot_dimension_numbers<[1], [0], [0], [1], [0, 0, 1, 1], [], []>} : vector<2x128xbf16>, vector<128x256xbf16>, vector<2x256xf32> -> vector<2x256xf32>
    %31 = arith.addf %25, %30 : vector<2x256xf32>
    %c6 = arith.constant 6 : index
    %c0_26 = arith.constant 0 : index
    %32 = vector.load %arg10[%c6, %c0_26] : memref<16x128xf32, #tpu.memory_space<vmem>>, vector<2x128xf32>
    %33 = arith.truncf %32 : vector<2x128xf32> to vector<2x128xbf16>
    %c3 = arith.constant 3 : index
    %c0_27 = arith.constant 0 : index
    %c0_28 = arith.constant 0 : index
    %34 = vector.load %arg4[%c3, %c0_27, %c0_28] : memref<8x128x256xbf16, #tpu.memory_space<vmem>>, vector<1x128x256xbf16>
    %35 = vector.shape_cast %34 : vector<1x128x256xbf16> to vector<128x256xbf16>
    %cst_29 = arith.constant dense<0.000000e+00> : vector<2x256xf32>
    %36 = tpu.matmul %33, %35, %cst_29 {dimension_numbers = #tpu.dot_dimension_numbers<[1], [0], [0], [1], [0, 0, 1, 1], [], []>} : vector<2x128xbf16>, vector<128x256xbf16>, vector<2x256xf32> -> vector<2x256xf32>
    %37 = arith.addf %31, %36 : vector<2x256xf32>
    %c8 = arith.constant 8 : index
    %c0_30 = arith.constant 0 : index
    %38 = vector.load %arg10[%c8, %c0_30] : memref<16x128xf32, #tpu.memory_space<vmem>>, vector<2x128xf32>
    %39 = arith.truncf %38 : vector<2x128xf32> to vector<2x128xbf16>
    %c4_31 = arith.constant 4 : index
    %c0_32 = arith.constant 0 : index
    %c0_33 = arith.constant 0 : index
    %40 = vector.load %arg4[%c4_31, %c0_32, %c0_33] : memref<8x128x256xbf16, #tpu.memory_space<vmem>>, vector<1x128x256xbf16>
    %41 = vector.shape_cast %40 : vector<1x128x256xbf16> to vector<128x256xbf16>
    %cst_34 = arith.constant dense<0.000000e+00> : vector<2x256xf32>
    %42 = tpu.matmul %39, %41, %cst_34 {dimension_numbers = #tpu.dot_dimension_numbers<[1], [0], [0], [1], [0, 0, 1, 1], [], []>} : vector<2x128xbf16>, vector<128x256xbf16>, vector<2x256xf32> -> vector<2x256xf32>
    %43 = arith.addf %37, %42 : vector<2x256xf32>
    %c10 = arith.constant 10 : index
    %c0_35 = arith.constant 0 : index
    %44 = vector.load %arg10[%c10, %c0_35] : memref<16x128xf32, #tpu.memory_space<vmem>>, vector<2x128xf32>
    %45 = arith.truncf %44 : vector<2x128xf32> to vector<2x128xbf16>
    %c5 = arith.constant 5 : index
    %c0_36 = arith.constant 0 : index
    %c0_37 = arith.constant 0 : index
    %46 = vector.load %arg4[%c5, %c0_36, %c0_37] : memref<8x128x256xbf16, #tpu.memory_space<vmem>>, vector<1x128x256xbf16>
    %47 = vector.shape_cast %46 : vector<1x128x256xbf16> to vector<128x256xbf16>
    %cst_38 = arith.constant dense<0.000000e+00> : vector<2x256xf32>
    %48 = tpu.matmul %45, %47, %cst_38 {dimension_numbers = #tpu.dot_dimension_numbers<[1], [0], [0], [1], [0, 0, 1, 1], [], []>} : vector<2x128xbf16>, vector<128x256xbf16>, vector<2x256xf32> -> vector<2x256xf32>
    %49 = arith.addf %43, %48 : vector<2x256xf32>
    %c12 = arith.constant 12 : index
    %c0_39 = arith.constant 0 : index
    %50 = vector.load %arg10[%c12, %c0_39] : memref<16x128xf32, #tpu.memory_space<vmem>>, vector<2x128xf32>
    %51 = arith.truncf %50 : vector<2x128xf32> to vector<2x128xbf16>
    %c6_40 = arith.constant 6 : index
    %c0_41 = arith.constant 0 : index
    %c0_42 = arith.constant 0 : index
    %52 = vector.load %arg4[%c6_40, %c0_41, %c0_42] : memref<8x128x256xbf16, #tpu.memory_space<vmem>>, vector<1x128x256xbf16>
    %53 = vector.shape_cast %52 : vector<1x128x256xbf16> to vector<128x256xbf16>
    %cst_43 = arith.constant dense<0.000000e+00> : vector<2x256xf32>
    %54 = tpu.matmul %51, %53, %cst_43 {dimension_numbers = #tpu.dot_dimension_numbers<[1], [0], [0], [1], [0, 0, 1, 1], [], []>} : vector<2x128xbf16>, vector<128x256xbf16>, vector<2x256xf32> -> vector<2x256xf32>
    %55 = arith.addf %49, %54 : vector<2x256xf32>
    %c14 = arith.constant 14 : index
    %c0_44 = arith.constant 0 : index
    %56 = vector.load %arg10[%c14, %c0_44] : memref<16x128xf32, #tpu.memory_space<vmem>>, vector<2x128xf32>
    %57 = arith.truncf %56 : vector<2x128xf32> to vector<2x128xbf16>
    %c7 = arith.constant 7 : index
    %c0_45 = arith.constant 0 : index
    %c0_46 = arith.constant 0 : index
    %58 = vector.load %arg4[%c7, %c0_45, %c0_46] : memref<8x128x256xbf16, #tpu.memory_space<vmem>>, vector<1x128x256xbf16>
    %59 = vector.shape_cast %58 : vector<1x128x256xbf16> to vector<128x256xbf16>
    %cst_47 = arith.constant dense<0.000000e+00> : vector<2x256xf32>
    %60 = tpu.matmul %57, %59, %cst_47 {dimension_numbers = #tpu.dot_dimension_numbers<[1], [0], [0], [1], [0, 0, 1, 1], [], []>} : vector<2x128xbf16>, vector<128x256xbf16>, vector<2x256xf32> -> vector<2x256xf32>
    %61 = arith.addf %55, %60 : vector<2x256xf32>
    %c0_48 = arith.constant 0 : index
    %c0_49 = arith.constant 0 : index
    %62 = vector.load %arg9[%c0_48, %c0_49] : memref<2x256xf32, #tpu.memory_space<vmem>>, vector<2x256xf32>
    tpu.vector_store %arg9[%c0_48, %c0_49], %61 {strides = array<i32>} : memref<2x256xf32, #tpu.memory_space<vmem>>, vector<2x256xf32>,
    %c4_i32 = arith.constant 4 : i32
    %63 = arith.cmpi eq, %arg0, %c4_i32 : i32
    %64 = arith.extui %63 : i1 to i32
    %c0_i32_50 = arith.constant 0 : i32
    %65 = arith.cmpi ne, %64, %c0_i32_50 : i32
    scf.if %65 {
      %c0_51 = arith.constant 0 : index
      %c0_52 = arith.constant 0 : index
      %66 = vector.load %arg5[%c0_51, %c0_52] : memref<1x256xf32, #tpu.memory_space<vmem>>, vector<1x256xf32>
      %67 = vector.broadcast %66 : vector<1x256xf32> to vector<2x256xf32>
      %68 = arith.addf %61, %67 : vector<2x256xf32>
      %cst_53 = arith.constant 0.000000e+00 : f32
      %69 = vector.broadcast %cst_53 : f32 to vector<2x256xf32>
      %70 = arith.maximumf %68, %69 : vector<2x256xf32>
      %71 = arith.truncf %70 : vector<2x256xf32> to vector<2x256xbf16>
      %c0_54 = arith.constant 0 : index
      %c0_55 = arith.constant 0 : index
      %72 = vector.load %arg6[%c0_54, %c0_55] : memref<256x10xbf16, #tpu.memory_space<vmem>>, vector<256x10xbf16>
      %cst_56 = arith.constant dense<0.000000e+00> : vector<2x10xf32>
      %73 = tpu.matmul %71, %72, %cst_56 {dimension_numbers = #tpu.dot_dimension_numbers<[1], [0], [0], [1], [0, 0, 1, 1], [], []>} : vector<2x256xbf16>, vector<256x10xbf16>, vector<2x10xf32> -> vector<2x10xf32>
      %c0_57 = arith.constant 0 : index
      %c0_58 = arith.constant 0 : index
      %74 = vector.load %arg7[%c0_57, %c0_58] : memref<1x10xf32, #tpu.memory_space<vmem>>, vector<1x10xf32>
      %75 = vector.broadcast %74 : vector<1x10xf32> to vector<2x10xf32>
      %76 = arith.addf %73, %75 : vector<2x10xf32>
      %c0_59 = arith.constant 0 : index
      %c0_60 = arith.constant 0 : index
      %77 = vector.load %arg8[%c0_59, %c0_60] : memref<2x10xf32, #tpu.memory_space<vmem>>, vector<2x10xf32>
      tpu.vector_store %arg8[%c0_59, %c0_60], %76 {strides = array<i32>} : memref<2x10xf32, #tpu.memory_space<vmem>>, vector<2x10xf32>,
    } else {
    }
    return
  }
  func.func @transform_0(%arg0: i32) -> (i32, i32) {
    %c0_i32 = arith.constant 0 : i32
    %c0_i32_0 = arith.constant 0 : i32
    return %arg0, %c0_i32 : i32, i32
  }
  func.func @transform_1(%arg0: i32) -> (i32, i32) {
    %c0_i32 = arith.constant 0 : i32
    %c0_i32_0 = arith.constant 0 : i32
    %c0_i32_1 = arith.constant 0 : i32
    return %c0_i32, %c0_i32_0 : i32, i32
  }
  func.func @transform_2(%arg0: i32) -> (i32, i32) {
    %c0_i32 = arith.constant 0 : i32
    %c0_i32_0 = arith.constant 0 : i32
    %c0_i32_1 = arith.constant 0 : i32
    return %c0_i32, %c0_i32_0 : i32, i32
  }
  func.func @transform_3(%arg0: i32) -> (i32, i32, i32) {
    %c0_i32 = arith.constant 0 : i32
    %c0_i32_0 = arith.constant 0 : i32
    %c0_i32_1 = arith.constant 0 : i32
    return %arg0, %c0_i32, %c0_i32_0 : i32, i32, i32
  }
  func.func @transform_4(%arg0: i32) -> (i32, i32) {
    %c0_i32 = arith.constant 0 : i32
    %c0_i32_0 = arith.constant 0 : i32
    %c0_i32_1 = arith.constant 0 : i32
    return %c0_i32, %c0_i32_0 : i32, i32
  }
  func.func @transform_5(%arg0: i32) -> (i32, i32) {
    %c0_i32 = arith.constant 0 : i32
    %c0_i32_0 = arith.constant 0 : i32
    %c0_i32_1 = arith.constant 0 : i32
    return %c0_i32, %c0_i32_0 : i32, i32
  }
  func.func @transform_6(%arg0: i32) -> (i32, i32) {
    %c0_i32 = arith.constant 0 : i32
    %c0_i32_0 = arith.constant 0 : i32
    %c0_i32_1 = arith.constant 0 : i32
    return %c0_i32, %c0_i32_0 : i32, i32
  }
  func.func @transform_7(%arg0: i32) -> (i32, i32) {
    %c0_i32 = arith.constant 0 : i32
    %c0_i32_0 = arith.constant 0 : i32
    %c0_i32_1 = arith.constant 0 : i32
    return %c0_i32, %c0_i32_0 : i32, i32
  }
}

</mosaic_0001>

<bundles_post_ra>
// kernel: _lambda_.2
= control target key start
LH: loop header
LB: loop body
LE: loop exit
PB: predicated region body
PF: predicated region fallthrough
CT: control target
= control target key end

     0   :  { %s478_s12 = smov 0   ;;  %s551_s0 = inlined_call_operand.vmem [shape: f32[160,128], index: 0, kind: input, shape index: {}]   ;;  %s552_s1 = inlined_call_operand.vmem [shape: bf16[128,32], index: 1, kind: input, shape index: {}]   ;;  %s553_s2 = inlined_call_operand.vmem [shape: f32[1,32], index: 2, kind: input, shape index: {}]   ;;  %s554_s3 = inlined_call_operand.vmem [shape: f32[160,32], index: 3, kind: output, shape index: {}]  }
   0x1 LB: > { %s368_s13 = sadd.s32 4294967295, %s456_s12   ;;  %p372_p0 = scmp.ge.s32.totalorder %s456_s12, 1  ;;  %s456_s12 = sphi %s478_s12, %s13_s12  }
   0x2   : > { %p138_p1 = scmp.lt.s32.totalorder %s456_s12, 3 }
   0x4   : > { %p139_p2 = pnand %p372_p0, %p138_p1 }
   0x5   : > { %s162_s20 = smul.u32 (!%p139_p2), 10, %s368_s13 }
   0x6   : > { %142 = sbr.rel (%p139_p2) target bundleno = 204 (0xcc), region = 32 }
   0x7   : > { %p163_p3 = scmp.lt.s32.totalorder (!%p139_p2), %s162_s20, 19 }
   0xb   : > { %v416_v0 = vld [vmem:[%s552_s1 + $0x38] sm:$0xff]  ;;  %v415_v1 = vld [vmem:[%s552_s1 + $0x30] sm:$0xff]  ;;  %v414_v2 = vld [vmem:[%s552_s1 + $0x28] sm:$0xff]  ;;  %s556_s20 = smov (!%p163_p3, %s162_s20), 19  ;;  %vm301_vm0 = vcmask 261120  }
   0xc   : > { %419 = vmatpush.bf16.msra.mxu3 %v416_v0  ;;  %418 = vmatpush.bf16.msra.mxu2 %v416_v0  ;;  %v413_v3 = vld [vmem:[%s552_s1 + $0x20] sm:$0xff]  ;;  %v412_v4 = vld [vmem:[%s552_s1 + $0x18] sm:$0xff]  ;;  %v411_v5 = vld [vmem:[%s552_s1 + $0x10] sm:$0xff]  ;;  %s373_s27 = sshll.u32 %s556_s20, 3 }
   0xd   : > { %257 = vmatpush.bf16.msra.mxu0 %v416_v0  ;;  %417 = vmatpush.bf16.msra.mxu1 %v416_v0  ;;  %v410_v6 = vld [vmem:[%s552_s1 + $0x8] sm:$0xff]  ;;  %s166_s5 = scalar_lea.vmem %s551_s0, %s373_s27  ;;  %v409_v7 = vld [vmem:[%s552_s1] sm:$0xff]  ;;  %s526_s13 = scalar_lea.vmem %s554_s3, %s373_s27 }
   0xe   : > { %v180_v8 = vld [vmem:[%s166_s5 + $0x30] sm:$0xff]  ;;  %v181_v9 = vld [vmem:[%s166_s5 + $0x38] sm:$0xff]  ;;  %v178_v10 = vld [vmem:[%s166_s5 + $0x20] sm:$0xff] }
   0xf   : > { %v179_v11 = vld [vmem:[%s166_s5 + $0x28] sm:$0xff]  ;;  %v174_v12 = vld [vmem:[%s166_s5] sm:$0xff]  ;;  %v176_v14 = vld [vmem:[%s166_s5 + $0x10] sm:$0xff]  ;;  %v187_v16 = vpack.c.bf16 %v181_v9, %v180_v8 }
  0x10   : > { %422 = vmatpush.bf16.msra.mxu3 %v415_v1  ;;  %421 = vmatpush.bf16.msra.mxu2 %v415_v1  ;;  %v175_v13 = vld [vmem:[%s166_s5 + $0x8] sm:$0xff]  ;;  %v177_v15 = vld [vmem:[%s166_s5 + $0x18] sm:$0xff]  ;;  %v186_v17 = vpack.c.bf16 %v179_v11, %v178_v10  ;;  %v182_v20 = vld [vmem:[%s166_s5 + $0x40] sm:$0xff] }
  0x11   : > { %258 = vmatpush.bf16.msra.mxu0 %v415_v1  ;;  %420 = vmatpush.bf16.msra.mxu1 %v415_v1  ;;  %v184_v18 = vpack.c.bf16 %v175_v13, %v174_v12  ;;  %v185_v19 = vpack.c.bf16 %v177_v15, %v176_v14  ;;  %v183_v21 = vld [vmem:[%s166_s5 + $0x48] sm:$0xff]  ;;  %v449_v23 = vld [vmem:[%s553_s2] ss:$0 sm:$0xff] }
  0x12   : > { %v188_v22 = vpack.c.bf16 %v183_v21, %v182_v20 }
  0x14   : > { %425 = vmatpush.bf16.msra.mxu3 %v414_v2  ;;  %424 = vmatpush.bf16.msra.mxu2 %v414_v2 }
  0x15   : > { %259 = vmatpush.bf16.msra.mxu0 %v414_v2  ;;  %423 = vmatpush.bf16.msra.mxu1 %v414_v2 }
  0x18   : > { %428 = vmatpush.bf16.msra.mxu3 %v413_v3  ;;  %427 = vmatpush.bf16.msra.mxu2 %v413_v3 }
  0x19   : > { %260 = vmatpush.bf16.msra.mxu0 %v413_v3  ;;  %426 = vmatpush.bf16.msra.mxu1 %v413_v3 }
  0x1c   : > { %431 = vmatpush.bf16.msra.mxu3 %v412_v4  ;;  %430 = vmatpush.bf16.msra.mxu2 %v412_v4 }
  0x1d   : > { %261 = vmatpush.bf16.msra.mxu0 %v412_v4  ;;  %429 = vmatpush.bf16.msra.mxu1 %v412_v4 }
  0x20   : > { %434 = vmatpush.bf16.msra.mxu3 %v411_v5  ;;  %433 = vmatpush.bf16.msra.mxu2 %v411_v5 }
  0x21   : > { %262 = vmatpush.bf16.msra.mxu0 %v411_v5  ;;  %432 = vmatpush.bf16.msra.mxu1 %v411_v5 }
  0x24   : > { %437 = vmatpush.bf16.msra.mxu3 %v410_v6  ;;  %436 = vmatpush.bf16.msra.mxu2 %v410_v6 }
  0x25   : > { %263 = vmatpush.bf16.msra.mxu0 %v410_v6  ;;  %435 = vmatpush.bf16.msra.mxu1 %v410_v6 }
  0x28   : > { %440 = vmatpush.bf16.msra.mxu3 %v409_v7  ;;  %439 = vmatpush.bf16.msra.mxu2 %v409_v7 }
  0x29   : > { %264 = vmatpush.bf16.msra.mxu0 %v409_v7  ;;  %438 = vmatpush.bf16.msra.mxu1 %v409_v7 }
  0x2b   : > { %280 = vmatmul.bf16.vlgmr.msra.gmra.mxu3 %v187_v16  ;;  %275 = vmatmul.bf16.vlgmr.msra.gmra.mxu2 %v186_v17 }
  0x2c   : > { %265 = vmatmul.bf16.vlgmr.msra.gmra.mxu0 %v184_v18  ;;  %270 = vmatmul.bf16.vlgmr.msra.gmra.mxu1 %v185_v19 }
  0x3b   : > { %285 = vmatmul.bf16.gmra.mxu3 %v188_v22 }
  0xa9   : > { %v266_v24 = vpop.f32.mrf.mxu0  ;;  %v271_v25 = vpop.f32.mrf.mxu1 }
  0xaa   : > { %v267_v26 = vadd.f32 %v449_v23, %v266_v24  ;;  %v272_v27 = vadd.f32 %v449_v23, %v271_v25 }
  0xac   : > { %v291_v28 = vmax.f32 %v267_v26, 0.0  ;;  %v293_v29 = vmax.f32 %v272_v27, 0.0 }
  0xae   : > { %v281_v30 = vpop.f32.mrf.mxu3  ;;  %302 = vst.msk [vmem:[%s526_s13] sm:$0xff] %vm301_vm0, %v291_v28  ;;  %v276_v31 = vpop.f32.mrf.mxu2 }
  0xaf   : > { %v282_v32 = vadd.f32 %v449_v23, %v281_v30  ;;  %304 = vst.msk [vmem:[%s526_s13 + $0x10] sm:$0xff] %vm301_vm0, %v293_v29  ;;  %v277_v33 = vadd.f32 %v449_v23, %v276_v31 }
  0xb1   : > { %v297_v34 = vmax.f32 %v282_v32, 0.0  ;;  %v295_v35 = vmax.f32 %v277_v33, 0.0  ;;  %v268_v36 = vpop.f32.mrf.mxu0  ;;  %v273_v37 = vpop.f32.mrf.mxu1 }
  0xb2   : > { %v269_v38 = vadd.f32 %v449_v23, %v268_v36  ;;  %v274_v39 = vadd.f32 %v449_v23, %v273_v37 }
  0xb3   : > { %308 = vst.msk [vmem:[%s526_s13 + $0x30] sm:$0xff] %vm301_vm0, %v297_v34 }
  0xb4   : > { %306 = vst.msk [vmem:[%s526_s13 + $0x20] sm:$0xff] %vm301_vm0, %v295_v35  ;;  %v292_v40 = vmax.f32 %v269_v38, 0.0  ;;  %v294_v41 = vmax.f32 %v274_v39, 0.0 }
  0xb6   : > { %v283_v42 = vpop.f32.mrf.mxu3  ;;  %303 = vst.msk [vmem:[%s526_s13 + $0x8] sm:$0xff] %vm301_vm0, %v292_v40  ;;  %v278_v43 = vpop.f32.mrf.mxu2 }
  0xb7   : > { %v284_v44 = vadd.f32 %v449_v23, %v283_v42  ;;  %305 = vst.msk [vmem:[%s526_s13 + $0x18] sm:$0xff] %vm301_vm0, %v294_v41  ;;  %v279_v45 = vadd.f32 %v449_v23, %v278_v43 }
  0xb9   : > { %v298_v46 = vmax.f32 %v284_v44, 0.0  ;;  %v296_v47 = vmax.f32 %v279_v45, 0.0 }
  0xbb   : > { %309 = vst.msk [vmem:[%s526_s13 + $0x38] sm:$0xff] %vm301_vm0, %v298_v46 }
  0xbc   : > { %307 = vst.msk [vmem:[%s526_s13 + $0x28] sm:$0xff] %vm301_vm0, %v296_v47 }
  0xbe   : > { %v286_v48 = vpop.f32.mrf.mxu3 }
  0xbf   : > { %v287_v49 = vadd.f32 %v449_v23, %v286_v48 }
  0xc1   : > { %v299_v50 = vmax.f32 %v287_v49, 0.0 }
  0xc3   : > { %310 = vst.msk [vmem:[%s526_s13 + $0x40] sm:$0xff] %vm301_vm0, %v299_v50 }
  0xc6   : > { %v288_v51 = vpop.f32.mrf.mxu3 }
  0xc7   : > { %v289_v52 = vadd.f32 %v449_v23, %v288_v51 }
  0xc9   : > { %v300_v53 = vmax.f32 %v289_v52, 0.0 }
  0xcb   : > { %311 = vst.msk [vmem:[%s526_s13 + $0x48] sm:$0xff] %vm301_vm0, %v300_v53 }
  0xcc PF: > { %s13_s12 = sadd.s32 1, %s456_s12  }
  0xcd   : > { %p10_p4 = scmp.ge.s32.totalorder %s13_s12, 4  }
  0xcf   :  { %12 = sbr.rel (!%p10_p4) target bundleno = 1 (0x1), region = 62 }

// kernel: _lambda_.3
= control target key start
LH: loop header
LB: loop body
LE: loop exit
PB: predicated region body
PF: predicated region fallthrough
CT: control target
= control target key end

     0   :  { %12 = vsyncpa [#allocation5], 0  ;;  %s3033_s24 = smov 0   ;;  %s3490_s0 = inlined_call_operand.vmem [shape: f32[80,512], index: 0, kind: input, shape index: {}]   ;;  %s3491_s1 = inlined_call_operand.vmem [shape: bf16[512,128], index: 1, kind: input, shape index: {}]   ;;  %s3492_s2 = inlined_call_operand.vmem [shape: f32[1,128], index: 2, kind: input, shape index: {}]   ;;  %s3493_s3 = inlined_call_operand.vmem [shape: bf16[40,128,256], index: 3, kind: input, shape index: {}]   ;;  %s3494_s4 = inlined_call_operand.vmem [shape: f32[1,256], index: 4, kind: input, shape index: {}]   ;;  %s3495_s5 = inlined_call_operand.vmem [shape: bf16[256,10], index: 5, kind: input, shape index: {}]   ;;  %s3496_s6 = inlined_call_operand.vmem [shape: f32[1,10], index: 6, kind: input, shape index: {}]   ;;  %s3497_s7 = inlined_call_operand.hbm [shape: f32[2,10], index: 7, kind: output, shape index: {}]  }
   0x1 LB: > { %s3039_s25 = sadd.s32 4294967295, %s2989_s24   ;;  %p1926_p0 = scmp.ge.s32.totalorder %s2989_s24, 1  ;;  %s2989_s24 = sphi %s3033_s24, %s18_s24  }
   0x2   : > { %p247_p1 = scmp.lt.s32.totalorder %s2989_s24, 6 }
   0x4   : > { %p248_p2 = pnand %p1926_p0, %p247_p1 }
   0x5   : > { %s1927_s26 = sshll.u32 (!%p248_p2), %s3039_s25, 1  ;;  %s1930_s27 = sshll.u32 (!%p248_p2), %s3039_s25, 3 }
   0x6   : > { %251 = sbr.rel (%p248_p2) target bundleno = 581 (0x245), region = 48  ;;  %p282_p3 = scmp.lt.s32.totalorder (!%p248_p2), %s1927_s26, 9 }
   0x7   : > { %p289_p4 = scmp.lt.s32.totalorder (!%p248_p2), %s1930_s27, 39  ;;  %p1933_p5 = scmp.ne.s32.totalorder (!%p248_p2), %s3039_s25, 0 }
   0xb   : > { %s3499_s26 = smov (!%p282_p3, %s1927_s26), 9  ;;  %s3501_s27 = smov (!%p289_p4, %s1930_s27), 39 }
   0xc   : > { %s2755_s28 = sshll.u32 %s3499_s26, 5  ;;  %s2756_s9 = sshll.u32 %s3501_s27, 7 }
   0xd   : > { %s3048_s8 = scalar_lea.vmem %s3490_s0, %s2755_s28  ;;  %s3053_s12 = scalar_lea.vmem %s3493_s3, %s2756_s9 }
   0xe   : > { %298 = sbr.rel (%p1933_p5) target bundleno = 21 (0x15), region = 52 }
  0x13   : > { %v2991_v0 = vmov 0.0  }
  0x14   : > { %299 = vst [vmem:[#allocation2] sm:$0xf] %v2991_v0 }
  0x15 PF: > { %v2764_v1 = vld [vmem:[%s3491_s1 + $0x38] sm:$0xff]  ;;  %v2763_v5 = vld [vmem:[%s3491_s1 + $0x30] sm:$0xff]  ;;  %v2762_v9 = vld [vmem:[%s3491_s1 + $0x28] sm:$0xff]  ;;  %vm760_vm0 = vcmask 1041408   ;;  %p2686_p6 = scmp.ne.s32.totalorder %s3039_s25, 4 }
  0x16   : > { %v2772_v2 = vld [vmem:[%s3491_s1 + $0x78] sm:$0xff]  ;;  %572 = vmatpush.bf16.msra.mxu0 %v2764_v1  ;;  %v2771_v6 = vld [vmem:[%s3491_s1 + $0x70] sm:$0xff]  ;;  %v2770_v10 = vld [vmem:[%s3491_s1 + $0x68] sm:$0xff] }
  0x17   : > { %v2780_v3 = vld [vmem:[%s3491_s1 + $0xb8] sm:$0xff]  ;;  %586 = vmatpush.bf16.msra.mxu1 %v2772_v2  ;;  %v2779_v7 = vld [vmem:[%s3491_s1 + $0xb0] sm:$0xff]  ;;  %v2778_v11 = vld [vmem:[%s3491_s1 + $0xa8] sm:$0xff] }
  0x18   : > { %v2788_v4 = vld [vmem:[%s3491_s1 + $0xf8] sm:$0xff]  ;;  %600 = vmatpush.bf16.msra.mxu2 %v2780_v3  ;;  %v2787_v8 = vld [vmem:[%s3491_s1 + $0xf0] sm:$0xff]  ;;  %v2786_v12 = vld [vmem:[%s3491_s1 + $0xe8] sm:$0xff] }
  0x19   : > { %614 = vmatpush.bf16.msra.mxu3 %v2788_v4  ;;  %v2761_v13 = vld [vmem:[%s3491_s1 + $0x20] sm:$0xff]  ;;  %v2760_v17 = vld [vmem:[%s3491_s1 + $0x18] sm:$0xff]  ;;  %v2759_v21 = vld [vmem:[%s3491_s1 + $0x10] sm:$0xff] }
  0x1a   : > { %573 = vmatpush.bf16.msra.mxu0 %v2763_v5  ;;  %v2769_v14 = vld [vmem:[%s3491_s1 + $0x60] sm:$0xff]  ;;  %v2768_v18 = vld [vmem:[%s3491_s1 + $0x58] sm:$0xff]  ;;  %v2767_v22 = vld [vmem:[%s3491_s1 + $0x50] sm:$0xff] }
  0x1b   : > { %587 = vmatpush.bf16.msra.mxu1 %v2771_v6  ;;  %v2777_v15 = vld [vmem:[%s3491_s1 + $0xa0] sm:$0xff]  ;;  %v2776_v19 = vld [vmem:[%s3491_s1 + $0x98] sm:$0xff]  ;;  %v2775_v23 = vld [vmem:[%s3491_s1 + $0x90] sm:$0xff] }
  0x1c   : > { %601 = vmatpush.bf16.msra.mxu2 %v2779_v7  ;;  %v2785_v16 = vld [vmem:[%s3491_s1 + $0xe0] sm:$0xff]  ;;  %v2784_v20 = vld [vmem:[%s3491_s1 + $0xd8] sm:$0xff]  ;;  %v2783_v24 = vld [vmem:[%s3491_s1 + $0xd0] sm:$0xff] }
  0x1d   : > { %615 = vmatpush.bf16.msra.mxu3 %v2787_v8  ;;  %v2758_v25 = vld [vmem:[%s3491_s1 + $0x8] sm:$0xff]  ;;  %v2757_v29 = vld [vmem:[%s3491_s1] sm:$0xff]  ;;  %v2120_v35 = vld [vmem:[%s3053_s12 + $0x70] sm:$0xf] }
  0x1e   : > { %574 = vmatpush.bf16.msra.mxu0 %v2762_v9  ;;  %v2766_v26 = vld [vmem:[%s3491_s1 + $0x48] sm:$0xff]  ;;  %v2765_v30 = vld [vmem:[%s3491_s1 + $0x40] sm:$0xff]  ;;  %v2804_v38 = vld [vmem:[%s3053_s12 + $0x74] sm:$0xf0] }
  0x1f   : > { %588 = vmatpush.bf16.msra.mxu1 %v2770_v10  ;;  %v2774_v27 = vld [vmem:[%s3491_s1 + $0x88] sm:$0xff]  ;;  %v300_v31 = vld [vmem:[%s3048_s8] sm:$0xff]  ;;  %v2803_v39 = vld [vmem:[%s3053_s12 + $0x74] sm:$0xf]  ;;  %v2121_v47 = vor.u32 %v2804_v38, %v2120_v35 }
  0x20   : > { %602 = vmatpush.bf16.msra.mxu2 %v2778_v11  ;;  %v2782_v28 = vld [vmem:[%s3491_s1 + $0xc8] sm:$0xff]  ;;  %v304_v32 = vld [vmem:[%s3048_s8 + $0x20] sm:$0xff]  ;;  %v2122_v40 = vld [vmem:[%s3053_s12 + $0x78] sm:$0xf0] }
  0x21   : > { %616 = vmatpush.bf16.msra.mxu3 %v2786_v12  ;;  %v301_v33 = vld [vmem:[%s3048_s8 + $0x8] sm:$0xff]  ;;  %v2773_v36 = vld [vmem:[%s3491_s1 + $0x80] sm:$0xff]  ;;  %v302_v41 = vld [vmem:[%s3048_s8 + $0x10] sm:$0xff]  ;;  %v2125_v48 = vor.u32 %v2803_v39, %v2122_v40  ;;  %v308_v52 = vpack.c.bf16 %v304_v32, %v300_v31 }
  0x22   : > { %575 = vmatpush.bf16.msra.mxu0 %v2761_v13  ;;  %v305_v34 = vld [vmem:[%s3048_s8 + $0x28] sm:$0xff]  ;;  %v2781_v37 = vld [vmem:[%s3491_s1 + $0xc0] sm:$0xff]  ;;  %v306_v42 = vld [vmem:[%s3048_s8 + $0x30] sm:$0xff] }
  0x23   : > { %589 = vmatpush.bf16.msra.mxu1 %v2769_v14  ;;  %v303_v43 = vld [vmem:[%s3048_s8 + $0x18] sm:$0xff]  ;;  %v2200_v45 = vld [vmem:[%s3053_s12 + $0xf0] sm:$0xf]  ;;  %v2819_v49 = vld [vmem:[%s3053_s12 + $0xf4] sm:$0xf]  ;;  %v309_v53 = vpack.c.bf16 %v305_v34, %v301_v33  ;;  %v310_v57 = vpack.c.bf16 %v306_v42, %v302_v41 }
  0x24   : > { %603 = vmatpush.bf16.msra.mxu2 %v2777_v15  ;;  %v307_v44 = vld [vmem:[%s3048_s8 + $0x38] sm:$0xff]  ;;  %v2112_v51 = vld [vmem:[%s3053_s12 + $0x60] sm:$0xf]  ;;  %v2802_v54 = vld [vmem:[%s3053_s12 + $0x64] sm:$0xf0] }
  0x25   : > { %617 = vmatpush.bf16.msra.mxu3 %v2785_v16  ;;  %v2820_v46 = vld [vmem:[%s3053_s12 + $0xf4] sm:$0xf0]  ;;  %v2202_v50 = vld [vmem:[%s3053_s12 + $0xf8] sm:$0xf0]  ;;  %v2801_v55 = vld [vmem:[%s3053_s12 + $0x64] sm:$0xf]  ;;  %v311_v58 = vpack.c.bf16 %v307_v44, %v303_v43  ;;  %v2113_v63 = vor.u32 %v2802_v54, %v2112_v51 }
  0x26   : > { %576 = vmatpush.bf16.msra.mxu0 %v2760_v17  ;;  %v2114_v56 = vld [vmem:[%s3053_s12 + $0x68] sm:$0xf0]  ;;  %v2201_v59 = vor.u32 %v2820_v46, %v2200_v45  ;;  %v2205_v60 = vor.u32 %v2819_v49, %v2202_v50  ;;  %v2192_v61 = vld [vmem:[%s3053_s12 + $0xe0] sm:$0xf]  ;;  %v2818_v62 = vld [vmem:[%s3053_s12 + $0xe4] sm:$0xf0] }
  0x27   : > { %590 = vmatpush.bf16.msra.mxu1 %v2768_v18  ;;  %v2117_v0 = vor.u32 %v2801_v55, %v2114_v56  ;;  %v2817_v1 = vld [vmem:[%s3053_s12 + $0xe4] sm:$0xf]  ;;  %v2194_v2 = vld [vmem:[%s3053_s12 + $0xe8] sm:$0xf0]  ;;  %v2104_v3 = vld [vmem:[%s3053_s12 + $0x50] sm:$0xf]  ;;  %v2193_v7 = vor.u32 %v2818_v62, %v2192_v61 }
  0x28   : > { %604 = vmatpush.bf16.msra.mxu2 %v2776_v19  ;;  %v2800_v4 = vld [vmem:[%s3053_s12 + $0x54] sm:$0xf0]  ;;  %v2799_v5 = vld [vmem:[%s3053_s12 + $0x54] sm:$0xf]  ;;  %v2106_v6 = vld [vmem:[%s3053_s12 + $0x58] sm:$0xf0]  ;;  %v2197_v8 = vor.u32 %v2817_v1, %v2194_v2 }
  0x29   : > { %618 = vmatpush.bf16.msra.mxu3 %v2784_v20  ;;  %v2184_v9 = vld [vmem:[%s3053_s12 + $0xd0] sm:$0xf]  ;;  %v2816_v10 = vld [vmem:[%s3053_s12 + $0xd4] sm:$0xf0]  ;;  %v2105_v11 = vor.u32 %v2800_v4, %v2104_v3  ;;  %v2109_v12 = vor.u32 %v2799_v5, %v2106_v6  ;;  %v2815_v13 = vld [vmem:[%s3053_s12 + $0xd4] sm:$0xf] }
  0x2a   : > { %577 = vmatpush.bf16.msra.mxu0 %v2759_v21  ;;  %v2186_v14 = vld [vmem:[%s3053_s12 + $0xd8] sm:$0xf0]  ;;  %v2096_v15 = vld [vmem:[%s3053_s12 + $0x40] sm:$0xf]  ;;  %v2798_v16 = vld [vmem:[%s3053_s12 + $0x44] sm:$0xf0]  ;;  %v2185_v19 = vor.u32 %v2816_v10, %v2184_v9 }
  0x2b   : > { %591 = vmatpush.bf16.msra.mxu1 %v2767_v22  ;;  %v2797_v17 = vld [vmem:[%s3053_s12 + $0x44] sm:$0xf]  ;;  %v2098_v18 = vld [vmem:[%s3053_s12 + $0x48] sm:$0xf0]  ;;  %v2189_v20 = vor.u32 %v2815_v13, %v2186_v14  ;;  %v2176_v21 = vld [vmem:[%s3053_s12 + $0xc0] sm:$0xf] }
  0x2c   : > { %605 = vmatpush.bf16.msra.mxu2 %v2775_v23  ;;  %v2814_v22 = vld [vmem:[%s3053_s12 + $0xc4] sm:$0xf0]  ;;  %v2813_v23 = vld [vmem:[%s3053_s12 + $0xc4] sm:$0xf]  ;;  %v2168_v33 = vld [vmem:[%s3053_s12 + $0xb0] sm:$0xf] }
  0x2d   : > { %619 = vmatpush.bf16.msra.mxu3 %v2783_v24  ;;  %v2097_v24 = vor.u32 %v2798_v16, %v2096_v15  ;;  %v2177_v31 = vor.u32 %v2814_v22, %v2176_v21  ;;  %v2812_v34 = vld [vmem:[%s3053_s12 + $0xb4] sm:$0xf0]  ;;  %v2170_v38 = vld [vmem:[%s3053_s12 + $0xb8] sm:$0xf0]  ;;  %v2080_v39 = vld [vmem:[%s3053_s12 + $0x20] sm:$0xf] }
  0x2e   : > { %578 = vmatpush.bf16.msra.mxu0 %v2758_v25  ;;  %v2101_v25 = vor.u32 %v2797_v17, %v2098_v18  ;;  %v2794_v40 = vld [vmem:[%s3053_s12 + $0x24] sm:$0xf0]  ;;  %v2793_v41 = vld [vmem:[%s3053_s12 + $0x24] sm:$0xf]  ;;  %v2082_v42 = vld [vmem:[%s3053_s12 + $0x28] sm:$0xf0]  ;;  %v2169_v43 = vor.u32 %v2812_v34, %v2168_v33 }
  0x2f   : > { %592 = vmatpush.bf16.msra.mxu1 %v2766_v26  ;;  %v2178_v26 = vld [vmem:[%s3053_s12 + $0xc8] sm:$0xf0]  ;;  %v2160_v45 = vld [vmem:[%s3053_s12 + $0xa0] sm:$0xf]  ;;  %v2810_v46 = vld [vmem:[%s3053_s12 + $0xa4] sm:$0xf0] }
  0x30   : > { %606 = vmatpush.bf16.msra.mxu2 %v2774_v27  ;;  %v2088_v27 = vld [vmem:[%s3053_s12 + $0x30] sm:$0xf]  ;;  %v2181_v32 = vor.u32 %v2813_v23, %v2178_v26  ;;  %v2809_v49 = vld [vmem:[%s3053_s12 + $0xa4] sm:$0xf]  ;;  %v2162_v50 = vld [vmem:[%s3053_s12 + $0xa8] sm:$0xf0]  ;;  %v2161_v55 = vor.u32 %v2810_v46, %v2160_v45 }
  0x31   : > { %620 = vmatpush.bf16.msra.mxu3 %v2782_v28  ;;  %v2796_v28 = vld [vmem:[%s3053_s12 + $0x34] sm:$0xf0]  ;;  %v2072_v51 = vld [vmem:[%s3053_s12 + $0x10] sm:$0xf]  ;;  %v2074_v54 = vld [vmem:[%s3053_s12 + $0x18] sm:$0xf0]  ;;  %v2165_v56 = vor.u32 %v2809_v49, %v2162_v50 }
  0x32   : > { %579 = vmatpush.bf16.msra.mxu0 %v2757_v29  ;;  %v2795_v29 = vld [vmem:[%s3053_s12 + $0x34] sm:$0xf]  ;;  %v2089_v35 = vor.u32 %v2796_v28, %v2088_v27  ;;  %v2154_v62 = vld [vmem:[%s3053_s12 + $0x98] sm:$0xf0]  ;;  %v2789_v1 = vld [vmem:[%s3053_s12 + $0x4] sm:$0xf] }
  0x33   : > { %593 = vmatpush.bf16.msra.mxu1 %v2765_v30  ;;  %v2090_v30 = vld [vmem:[%s3053_s12 + $0x38] sm:$0xf0]  ;;  %v2066_v2 = vld [vmem:[%s3053_s12 + $0x8] sm:$0xf0]  ;;  %v2280_v3 = vld [vmem:[%s3053_s12 + $0x170] sm:$0xf] }
  0x34   : > { %607 = vmatpush.bf16.msra.mxu2 %v2773_v36  ;;  %v2093_v36 = vor.u32 %v2795_v29, %v2090_v30  ;;  %v2836_v4 = vld [vmem:[%s3053_s12 + $0x174] sm:$0xf0]  ;;  %v2835_v5 = vld [vmem:[%s3053_s12 + $0x174] sm:$0xf]  ;;  %v2282_v6 = vld [vmem:[%s3053_s12 + $0x178] sm:$0xf0]  ;;  %v2069_v13 = vor.u32 %v2789_v1, %v2066_v2 }
  0x35   : > { %621 = vmatpush.bf16.msra.mxu3 %v2781_v37  ;;  %580 = vmatmul.bf16.vlgmr.msra.gmra.mxu0 %v308_v52  ;;  %v2811_v37 = vld [vmem:[%s3053_s12 + $0xb4] sm:$0xf]  ;;  %v2792_v52 = vld [vmem:[%s3053_s12 + $0x14] sm:$0xf0]  ;;  %v2144_v9 = vld [vmem:[%s3053_s12 + $0x80] sm:$0xf]  ;;  %v2281_v17 = vor.u32 %v2836_v4, %v2280_v3  ;;  %v2285_v18 = vor.u32 %v2835_v5, %v2282_v6 }
  0x36   : > { %731 = vmatpush.bf16.msrb.mxu0 %v2121_v47  ;;  %594 = vmatmul.bf16.vlgmr.msra.gmra.mxu1 %v309_v53  ;;  %v2173_v44 = vor.u32 %v2811_v37, %v2170_v38  ;;  %v2081_v47 = vor.u32 %v2794_v40, %v2080_v39  ;;  %v2791_v53 = vld [vmem:[%s3053_s12 + $0x14] sm:$0xf]  ;;  %v2806_v10 = vld [vmem:[%s3053_s12 + $0x84] sm:$0xf0]  ;;  %v2146_v14 = vld [vmem:[%s3053_s12 + $0x88] sm:$0xf0] }
  0x37   : > { %744 = vmatpush.bf16.msrb.mxu1 %v2125_v48  ;;  %608 = vmatmul.bf16.vlgmr.msra.gmra.mxu2 %v310_v57  ;;  %v2085_v48 = vor.u32 %v2793_v41, %v2082_v42  ;;  %v2152_v57 = vld [vmem:[%s3053_s12 + $0x90] sm:$0xf]  ;;  %v2077_v61 = vor.u32 %v2791_v53, %v2074_v54  ;;  %v2852_v16 = vld [vmem:[%s3053_s12 + $0x1f4] sm:$0xf0]  ;;  %v2272_v21 = vld [vmem:[%s3053_s12 + $0x160] sm:$0xf] }
  0x38   : > { %622 = vmatmul.bf16.vlgmr.msra.gmra.mxu3 %v311_v58  ;;  %863 = vmatpush.bf16.msrb.mxu2 %v2201_v59  ;;  %v2808_v58 = vld [vmem:[%s3053_s12 + $0x94] sm:$0xf0]  ;;  %v2807_v59 = vld [vmem:[%s3053_s12 + $0x94] sm:$0xf]  ;;  %v2360_v15 = vld [vmem:[%s3053_s12 + $0x1f0] sm:$0xf] }
  0x39   : > { %876 = vmatpush.bf16.msrb.mxu3 %v2205_v60  ;;  %v2073_v60 = vor.u32 %v2792_v52, %v2072_v51  ;;  %v2834_v22 = vld [vmem:[%s3053_s12 + $0x164] sm:$0xf0]  ;;  %v2833_v23 = vld [vmem:[%s3053_s12 + $0x164] sm:$0xf]  ;;  %v2361_v27 = vor.u32 %v2852_v16, %v2360_v15  ;;  %v2352_v29 = vld [vmem:[%s3053_s12 + $0x1e0] sm:$0xf] }
  0x3a   : > { %732 = vmatpush.bf16.msrb.mxu0 %v2113_v63  ;;  %v2064_v63 = vld [vmem:[%s3053_s12] sm:$0xf]  ;;  %v2273_v30 = vor.u32 %v2834_v22, %v2272_v21  ;;  %v2849_v33 = vld [vmem:[%s3053_s12 + $0x1e4] sm:$0xf]  ;;  %v2354_v34 = vld [vmem:[%s3053_s12 + $0x1e8] sm:$0xf0] }
  0x3b   : > { %745 = vmatpush.bf16.msrb.mxu1 %v2117_v0  ;;  %v2790_v0 = vld [vmem:[%s3053_s12 + $0x4] sm:$0xf0]  ;;  %v2264_v37 = vld [vmem:[%s3053_s12 + $0x150] sm:$0xf]  ;;  %v2832_v38 = vld [vmem:[%s3053_s12 + $0x154] sm:$0xf0] }
  0x3c   : > { %864 = vmatpush.bf16.msrb.mxu2 %v2193_v7  ;;  %v2153_v7 = vor.u32 %v2808_v58, %v2152_v57  ;;  %v2831_v39 = vld [vmem:[%s3053_s12 + $0x154] sm:$0xf]  ;;  %v2265_v40 = vor.u32 %v2832_v38, %v2264_v37  ;;  %v2266_v41 = vld [vmem:[%s3053_s12 + $0x158] sm:$0xf0]  ;;  %v2344_v42 = vld [vmem:[%s3053_s12 + $0x1d0] sm:$0xf] }
  0x3d   : > { %877 = vmatpush.bf16.msrb.mxu3 %v2197_v8  ;;  %v2157_v8 = vor.u32 %v2807_v59, %v2154_v62  ;;  %v2847_v46 = vld [vmem:[%s3053_s12 + $0x1d4] sm:$0xf]  ;;  %v2256_v49 = vld [vmem:[%s3053_s12 + $0x140] sm:$0xf]  ;;  %v2830_v50 = vld [vmem:[%s3053_s12 + $0x144] sm:$0xf0] }
  0x3e   : > { %733 = vmatpush.bf16.msrb.mxu0 %v2105_v11  ;;  %v2805_v11 = vld [vmem:[%s3053_s12 + $0x84] sm:$0xf]  ;;  %v2257_v52 = vor.u32 %v2830_v50, %v2256_v49  ;;  %v2258_v53 = vld [vmem:[%s3053_s12 + $0x148] sm:$0xf0]  ;;  %v2336_v54 = vld [vmem:[%s3053_s12 + $0x1c0] sm:$0xf] }
  0x3f   : > { %746 = vmatpush.bf16.msrb.mxu1 %v2109_v12  ;;  %v2065_v12 = vor.u32 %v2790_v0, %v2064_v63  ;;  %v2149_v26 = vor.u32 %v2805_v11, %v2146_v14  ;;  %v2829_v51 = vld [vmem:[%s3053_s12 + $0x144] sm:$0xf]  ;;  %v2338_v59 = vld [vmem:[%s3053_s12 + $0x1c8] sm:$0xf0]  ;;  %v2828_v62 = vld [vmem:[%s3053_s12 + $0x134] sm:$0xf0] }
  0x40   : > { %865 = vmatpush.bf16.msrb.mxu2 %v2185_v19  ;;  %v2851_v19 = vld [vmem:[%s3053_s12 + $0x1f4] sm:$0xf]  ;;  %v2845_v58 = vld [vmem:[%s3053_s12 + $0x1c4] sm:$0xf]  ;;  %v2250_v1 = vld [vmem:[%s3053_s12 + $0x138] sm:$0xf0] }
  0x41   : > { %878 = vmatpush.bf16.msrb.mxu3 %v2189_v20  ;;  %v2362_v20 = vld [vmem:[%s3053_s12 + $0x1f8] sm:$0xf0]  ;;  %v2827_v63 = vld [vmem:[%s3053_s12 + $0x134] sm:$0xf]  ;;  %v2328_v2 = vld [vmem:[%s3053_s12 + $0x1b0] sm:$0xf] }
  0x42   : > { %734 = vmatpush.bf16.msrb.mxu0 %v2097_v24  ;;  %v2274_v24 = vld [vmem:[%s3053_s12 + $0x168] sm:$0xf0]  ;;  %v2365_v28 = vor.u32 %v2851_v19, %v2362_v20  ;;  %v2844_v3 = vld [vmem:[%s3053_s12 + $0x1b4] sm:$0xf0]  ;;  %v2253_v4 = vor.u32 %v2827_v63, %v2250_v1  ;;  %v2843_v6 = vld [vmem:[%s3053_s12 + $0x1b4] sm:$0xf] }
  0x43   : > { %747 = vmatpush.bf16.msrb.mxu1 %v2101_v25  ;;  %v2145_v25 = vor.u32 %v2806_v10, %v2144_v9  ;;  %v2329_v5 = vor.u32 %v2844_v3, %v2328_v2  ;;  %v2240_v9 = vld [vmem:[%s3053_s12 + $0x120] sm:$0xf]  ;;  %v2826_v10 = vld [vmem:[%s3053_s12 + $0x124] sm:$0xf0]  ;;  %v2825_v11 = vld [vmem:[%s3053_s12 + $0x124] sm:$0xf] }
  0x44   : > { %866 = vmatpush.bf16.msrb.mxu2 %v2177_v31  ;;  %v2277_v31 = vor.u32 %v2833_v23, %v2274_v24  ;;  %v2320_v14 = vld [vmem:[%s3053_s12 + $0x1a0] sm:$0xf]  ;;  %v2842_v15 = vld [vmem:[%s3053_s12 + $0x1a4] sm:$0xf0]  ;;  %v2322_v19 = vld [vmem:[%s3053_s12 + $0x1a8] sm:$0xf0] }
  0x45   : > { %879 = vmatpush.bf16.msrb.mxu3 %v2181_v32  ;;  %v2850_v32 = vld [vmem:[%s3053_s12 + $0x1e4] sm:$0xf0]  ;;  %v2232_v21 = vld [vmem:[%s3053_s12 + $0x110] sm:$0xf]  ;;  %v2824_v22 = vld [vmem:[%s3053_s12 + $0x114] sm:$0xf0] }
  0x46   : > { %735 = vmatpush.bf16.msrb.mxu0 %v2089_v35  ;;  %v2353_v35 = vor.u32 %v2850_v32, %v2352_v29  ;;  %v2823_v23 = vld [vmem:[%s3053_s12 + $0x114] sm:$0xf]  ;;  %v2233_v24 = vor.u32 %v2824_v22, %v2232_v21  ;;  %v2226_v37 = vld [vmem:[%s3053_s12 + $0x108] sm:$0xf0]  ;;  %v2304_v38 = vld [vmem:[%s3053_s12 + $0x180] sm:$0xf] }
  0x47   : > { %748 = vmatpush.bf16.msrb.mxu1 %v2093_v36  ;;  %v2357_v36 = vor.u32 %v2849_v33, %v2354_v34  ;;  %v2224_v33 = vld [vmem:[%s3053_s12 + $0x100] sm:$0xf]  ;;  %v2822_v34 = vld [vmem:[%s3053_s12 + $0x104] sm:$0xf0]  ;;  %v2440_v63 = vld [vmem:[%s3053_s12 + $0x270] sm:$0xf] }
  0x48   : > { %867 = vmatpush.bf16.msrb.mxu2 %v2169_v43  ;;  %v2848_v43 = vld [vmem:[%s3053_s12 + $0x1d4] sm:$0xf0]  ;;  %v2867_v1 = vld [vmem:[%s3053_s12 + $0x274] sm:$0xf]  ;;  %v2442_v2 = vld [vmem:[%s3053_s12 + $0x278] sm:$0xf0] }
  0x49   : > { %880 = vmatpush.bf16.msrb.mxu3 %v2173_v44  ;;  %v2269_v44 = vor.u32 %v2831_v39, %v2266_v41  ;;  %v2345_v45 = vor.u32 %v2848_v43, %v2344_v42  ;;  %v2838_v39 = vld [vmem:[%s3053_s12 + $0x184] sm:$0xf0]  ;;  %v2837_v42 = vld [vmem:[%s3053_s12 + $0x184] sm:$0xf]  ;;  %v2306_v43 = vld [vmem:[%s3053_s12 + $0x188] sm:$0xf0] }
  0x4a   : > { %736 = vmatpush.bf16.msrb.mxu0 %v2081_v47  ;;  %v2346_v47 = vld [vmem:[%s3053_s12 + $0x1d8] sm:$0xf0]  ;;  %v2305_v41 = vor.u32 %v2838_v39, %v2304_v38  ;;  %v2520_v3 = vld [vmem:[%s3053_s12 + $0x2f0] sm:$0xf]  ;;  %v2882_v21 = vld [vmem:[%s3053_s12 + $0x2e4] sm:$0xf0] }
  0x4b   : > { %749 = vmatpush.bf16.msrb.mxu1 %v2085_v48  ;;  %v2349_v48 = vor.u32 %v2847_v46, %v2346_v47  ;;  %v2881_v22 = vld [vmem:[%s3053_s12 + $0x2e4] sm:$0xf]  ;;  %v2416_v38 = vld [vmem:[%s3053_s12 + $0x240] sm:$0xf]  ;;  %v2862_v39 = vld [vmem:[%s3053_s12 + $0x244] sm:$0xf0] }
  0x4c   : > { %868 = vmatpush.bf16.msrb.mxu2 %v2161_v55  ;;  %v2846_v55 = vld [vmem:[%s3053_s12 + $0x1c4] sm:$0xf0] }
  0x4d   : > { %881 = vmatpush.bf16.msrb.mxu3 %v2165_v56  ;;  %v2261_v56 = vor.u32 %v2829_v51, %v2258_v53  ;;  %v2337_v57 = vor.u32 %v2846_v55, %v2336_v54 }
  0x4e   : > { %737 = vmatpush.bf16.msrb.mxu0 %v2073_v60  ;;  %v2341_v60 = vor.u32 %v2845_v58, %v2338_v59 }
  0x4f   : > { %750 = vmatpush.bf16.msrb.mxu1 %v2077_v61  ;;  %v2248_v61 = vld [vmem:[%s3053_s12 + $0x130] sm:$0xf] }
  0x50   : > { %869 = vmatpush.bf16.msrb.mxu2 %v2153_v7  ;;  %v2249_v0 = vor.u32 %v2828_v62, %v2248_v61  ;;  %v2330_v7 = vld [vmem:[%s3053_s12 + $0x1b8] sm:$0xf0] }
  0x51   : > { %882 = vmatpush.bf16.msrb.mxu3 %v2157_v8  ;;  %v2333_v8 = vor.u32 %v2843_v6, %v2330_v7  ;;  %v2883_v6 = vld [vmem:[%s3053_s12 + $0x2f4] sm:$0xf]  ;;  %v2522_v7 = vld [vmem:[%s3053_s12 + $0x2f8] sm:$0xf0] }
  0x52   : > { %738 = vmatpush.bf16.msrb.mxu0 %v2065_v12  ;;  %v2241_v12 = vor.u32 %v2826_v10, %v2240_v9 }
  0x53   : > { %751 = vmatpush.bf16.msrb.mxu1 %v2069_v13  ;;  %v2242_v13 = vld [vmem:[%s3053_s12 + $0x128] sm:$0xf0] }
  0x54   : > { %870 = vmatpush.bf16.msrb.mxu2 %v2145_v25  ;;  %v2245_v16 = vor.u32 %v2825_v11, %v2242_v13  ;;  %v2234_v25 = vld [vmem:[%s3053_s12 + $0x118] sm:$0xf0]  ;;  %v2445_v13 = vor.u32 %v2867_v1, %v2442_v2  ;;  %v2400_v1 = vld [vmem:[%s3053_s12 + $0x220] sm:$0xf]  ;;  %v2858_v2 = vld [vmem:[%s3053_s12 + $0x224] sm:$0xf0] }
  0x55   : > { %883 = vmatpush.bf16.msrb.mxu3 %v2149_v26  ;;  %v2312_v26 = vld [vmem:[%s3053_s12 + $0x190] sm:$0xf] }
  0x56   : > { %994 = vmatpush.bf16.msra.mxu0 %v2281_v17  ;;  %v2321_v17 = vor.u32 %v2842_v15, %v2320_v14  ;;  %v2432_v14 = vld [vmem:[%s3053_s12 + $0x260] sm:$0xf]  ;;  %v2866_v15 = vld [vmem:[%s3053_s12 + $0x264] sm:$0xf0] }
  0x57   : > { %1007 = vmatpush.bf16.msra.mxu1 %v2285_v18  ;;  %v2841_v18 = vld [vmem:[%s3053_s12 + $0x1a4] sm:$0xf] }
  0x58   : > { %1125 = vmatpush.bf16.msra.mxu2 %v2361_v27  ;;  %v2325_v20 = vor.u32 %v2841_v18, %v2322_v19  ;;  %v2840_v27 = vld [vmem:[%s3053_s12 + $0x194] sm:$0xf0]  ;;  %v2865_v18 = vld [vmem:[%s3053_s12 + $0x264] sm:$0xf]  ;;  %v2434_v19 = vld [vmem:[%s3053_s12 + $0x268] sm:$0xf0] }
  0x59   : > { %1138 = vmatpush.bf16.msra.mxu3 %v2365_v28  ;;  %v2237_v28 = vor.u32 %v2823_v23, %v2234_v25  ;;  %v2313_v29 = vor.u32 %v2840_v27, %v2312_v26  ;;  %v2514_v23 = vld [vmem:[%s3053_s12 + $0x2e8] sm:$0xf0]  ;;  %v2437_v25 = vor.u32 %v2865_v18, %v2434_v19  ;;  %v2424_v26 = vld [vmem:[%s3053_s12 + $0x250] sm:$0xf]  ;;  %v2864_v27 = vld [vmem:[%s3053_s12 + $0x254] sm:$0xf0] }
  0x5a   : > { %995 = vmatpush.bf16.msra.mxu0 %v2273_v30  ;;  %v2839_v30 = vld [vmem:[%s3053_s12 + $0x194] sm:$0xf]  ;;  %v2394_v19 = vld [vmem:[%s3053_s12 + $0x218] sm:$0xf0] }
  0x5b   : > { %1008 = vmatpush.bf16.msra.mxu1 %v2277_v31  ;;  %v2314_v31 = vld [vmem:[%s3053_s12 + $0x198] sm:$0xf0]  ;;  %v2855_v18 = vld [vmem:[%s3053_s12 + $0x214] sm:$0xf] }
  0x5c   : > { %1126 = vmatpush.bf16.msra.mxu2 %v2353_v35  ;;  %v2317_v32 = vor.u32 %v2839_v30, %v2314_v31  ;;  %v2821_v35 = vld [vmem:[%s3053_s12 + $0x104] sm:$0xf]  ;;  %v2863_v30 = vld [vmem:[%s3053_s12 + $0x254] sm:$0xf]  ;;  %v2426_v31 = vld [vmem:[%s3053_s12 + $0x258] sm:$0xf0] }
  0x5d   : > { %1139 = vmatpush.bf16.msra.mxu3 %v2357_v36  ;;  %v2225_v36 = vor.u32 %v2822_v34, %v2224_v33  ;;  %v2880_v33 = vld [vmem:[%s3053_s12 + $0x2d4] sm:$0xf0]  ;;  %v2879_v34 = vld [vmem:[%s3053_s12 + $0x2d4] sm:$0xf] }
  0x5e   : > { %996 = vmatpush.bf16.msra.mxu0 %v2265_v40  ;;  %v2229_v40 = vor.u32 %v2821_v35, %v2226_v37  ;;  %v2506_v35 = vld [vmem:[%s3053_s12 + $0x2d8] sm:$0xf0]  ;;  %v2429_v37 = vor.u32 %v2863_v30, %v2426_v31 }
  0x5f   : > { %1009 = vmatpush.bf16.msra.mxu1 %v2269_v44  ;;  %v2309_v44 = vor.u32 %v2837_v42, %v2306_v43  ;;  %v2861_v42 = vld [vmem:[%s3053_s12 + $0x244] sm:$0xf]  ;;  %v2418_v43 = vld [vmem:[%s3053_s12 + $0x248] sm:$0xf0] }
  0x60   : > { %1127 = vmatpush.bf16.msra.mxu2 %v2345_v45  ;;  %v2949_v45 = vld [vmem:[%s3492_s2] ss:$0 sm:$0xff] }
  0x61   : > { %1140 = vmatpush.bf16.msra.mxu3 %v2349_v48 }
  0x62   : > { %997 = vmatpush.bf16.msra.mxu0 %v2257_v52 }
  0x63   : > { %1010 = vmatpush.bf16.msra.mxu1 %v2261_v56 }
  0x64   : > { %1128 = vmatpush.bf16.msra.mxu2 %v2337_v57 }
  0x65   : > { %1141 = vmatpush.bf16.msra.mxu3 %v2341_v60 }
  0x66   : > { %998 = vmatpush.bf16.msra.mxu0 %v2249_v0  ;;  %v2868_v0 = vld [vmem:[%s3053_s12 + $0x274] sm:$0xf0] }
  0x67   : > { %1011 = vmatpush.bf16.msra.mxu1 %v2253_v4  ;;  %v2884_v4 = vld [vmem:[%s3053_s12 + $0x2f4] sm:$0xf0] }
  0x68   : > { %1129 = vmatpush.bf16.msra.mxu2 %v2329_v5 }
  0x69   : > { %1142 = vmatpush.bf16.msra.mxu3 %v2333_v8 }
  0x6a   : > { %999 = vmatpush.bf16.msra.mxu0 %v2241_v12  ;;  %v2441_v12 = vor.u32 %v2868_v0, %v2440_v63 }
  0x6b   : > { %1012 = vmatpush.bf16.msra.mxu1 %v2245_v16  ;;  %v2521_v16 = vor.u32 %v2884_v4, %v2520_v3 }
  0x6c   : > { %1130 = vmatpush.bf16.msra.mxu2 %v2321_v17  ;;  %v2525_v17 = vor.u32 %v2883_v6, %v2522_v7  ;;  %v2857_v6 = vld [vmem:[%s3053_s12 + $0x224] sm:$0xf]  ;;  %v2402_v7 = vld [vmem:[%s3053_s12 + $0x228] sm:$0xf0] }
  0x6d   : > { %1143 = vmatpush.bf16.msra.mxu3 %v2325_v20  ;;  %v2512_v20 = vld [vmem:[%s3053_s12 + $0x2e0] sm:$0xf] }
  0x6e   : > { %1000 = vmatpush.bf16.msra.mxu0 %v2233_v24  ;;  %v2433_v24 = vor.u32 %v2866_v15, %v2432_v14  ;;  %v2392_v14 = vld [vmem:[%s3053_s12 + $0x210] sm:$0xf]  ;;  %v2856_v15 = vld [vmem:[%s3053_s12 + $0x214] sm:$0xf0] }
  0x6f   : > { %1013 = vmatpush.bf16.msra.mxu1 %v2237_v28  ;;  %v2513_v28 = vor.u32 %v2882_v21, %v2512_v20  ;;  %v2472_v20 = vld [vmem:[%s3053_s12 + $0x290] sm:$0xf]  ;;  %v2872_v21 = vld [vmem:[%s3053_s12 + $0x294] sm:$0xf0] }
  0x70   : > { %1131 = vmatpush.bf16.msra.mxu2 %v2313_v29  ;;  %v2517_v29 = vor.u32 %v2881_v22, %v2514_v23  ;;  %v2871_v22 = vld [vmem:[%s3053_s12 + $0x294] sm:$0xf]  ;;  %v2474_v23 = vld [vmem:[%s3053_s12 + $0x298] sm:$0xf0]  ;;  %v2473_v30 = vor.u32 %v2872_v21, %v2472_v20  ;;  %v2656_v20 = vld [vmem:[%s3053_s12 + $0x3c0] sm:$0xf] }
  0x71   : > { %1144 = vmatpush.bf16.msra.mxu3 %v2317_v32  ;;  %v2504_v32 = vld [vmem:[%s3053_s12 + $0x2d0] sm:$0xf]  ;;  %v2477_v31 = vor.u32 %v2871_v22, %v2474_v23  ;;  %v2910_v21 = vld [vmem:[%s3053_s12 + $0x3c4] sm:$0xf0]  ;;  %v2909_v22 = vld [vmem:[%s3053_s12 + $0x3c4] sm:$0xf] }
  0x72   : > { %1001 = vmatpush.bf16.msra.mxu0 %v2225_v36  ;;  %v2425_v36 = vor.u32 %v2864_v27, %v2424_v26  ;;  %v2397_v26 = vor.u32 %v2855_v18, %v2394_v19  ;;  %v2854_v27 = vld [vmem:[%s3053_s12 + $0x204] sm:$0xf0]  ;;  %v2893_v18 = vld [vmem:[%s3053_s12 + $0x344] sm:$0xf]  ;;  %v2578_v19 = vld [vmem:[%s3053_s12 + $0x348] sm:$0xf0] }
  0x73   : > { %1014 = vmatpush.bf16.msra.mxu1 %v2229_v40  ;;  %v2505_v40 = vor.u32 %v2880_v33, %v2504_v32  ;;  %v2464_v32 = vld [vmem:[%s3053_s12 + $0x280] sm:$0xf]  ;;  %v2870_v33 = vld [vmem:[%s3053_s12 + $0x284] sm:$0xf0]  ;;  %v2658_v23 = vld [vmem:[%s3053_s12 + $0x3c8] sm:$0xf0] }
  0x74   : > { %1132 = vmatpush.bf16.msra.mxu2 %v2305_v41  ;;  %v2509_v41 = vor.u32 %v2879_v34, %v2506_v35  ;;  %v2869_v34 = vld [vmem:[%s3053_s12 + $0x284] sm:$0xf]  ;;  %v2466_v35 = vld [vmem:[%s3053_s12 + $0x288] sm:$0xf0] }
  0x75   : > { %1145 = vmatpush.bf16.msra.mxu3 %v2309_v44  ;;  %v2496_v44 = vld [vmem:[%s3053_s12 + $0x2c0] sm:$0xf] }
  0xb2   : > { %v581_v46 = vpop.f32.mrf.mxu0 }
  0xb3   : > { %v582_v47 = vadd.f32 %v2949_v45, %v581_v46  ;;  %v595_v48 = vpop.f32.mrf.mxu1  ;;  %v2877_v46 = vld [vmem:[%s3053_s12 + $0x2c4] sm:$0xf] }
  0xb5   : > { %v596_v49 = vadd.f32 %v595_v48, %v582_v47  ;;  %v2498_v47 = vld [vmem:[%s3053_s12 + $0x2c8] sm:$0xf0]  ;;  %v2408_v48 = vld [vmem:[%s3053_s12 + $0x230] sm:$0xf] }
  0xba   : > { %v609_v50 = vpop.f32.mrf.mxu2  ;;  %v583_v53 = vpop.f32.mrf.mxu0 }
  0xbb   : > { %v623_v51 = vpop.f32.mrf.mxu3  ;;  %v610_v52 = vadd.f32 %v609_v50, %v596_v49  ;;  %v584_v55 = vadd.f32 %v2949_v45, %v583_v53  ;;  %v597_v57 = vpop.f32.mrf.mxu1  ;;  %v2878_v45 = vld [vmem:[%s3053_s12 + $0x2c4] sm:$0xf0]  ;;  %v2417_v49 = vor.u32 %v2862_v39, %v2416_v38  ;;  %v2421_v50 = vor.u32 %v2861_v42, %v2418_v43  ;;  %v2410_v53 = vld [vmem:[%s3053_s12 + $0x238] sm:$0xf0]  ;;  %v2899_v38 = vld [vmem:[%s3053_s12 + $0x374] sm:$0xf] }
  0xbc   : > { %v2602_v39 = vld [vmem:[%s3053_s12 + $0x378] sm:$0xf0]  ;;  %v2916_v43 = vld [vmem:[%s3053_s12 + $0x3f4] sm:$0xf0] }
  0xbd   : > { %v624_v54 = vadd.f32 %v623_v51, %v610_v52  ;;  %v598_v58 = vadd.f32 %v597_v57, %v584_v55  ;;  %v2860_v51 = vld [vmem:[%s3053_s12 + $0x234] sm:$0xf0]  ;;  %v2859_v52 = vld [vmem:[%s3053_s12 + $0x234] sm:$0xf]  ;;  %v2501_v55 = vor.u32 %v2877_v46, %v2498_v47  ;;  %v2488_v57 = vld [vmem:[%s3053_s12 + $0x2b0] sm:$0xf]  ;;  %v2465_v46 = vor.u32 %v2870_v33, %v2464_v32 }
  0xbe   : > { %v2409_v63 = vor.u32 %v2860_v51, %v2408_v48  ;;  %v2413_v0 = vor.u32 %v2859_v52, %v2410_v53  ;;  %v2469_v47 = vor.u32 %v2869_v34, %v2466_v35  ;;  %v2592_v48 = vld [vmem:[%s3053_s12 + $0x360] sm:$0xf]  ;;  %v2898_v51 = vld [vmem:[%s3053_s12 + $0x364] sm:$0xf0]  ;;  %v2897_v52 = vld [vmem:[%s3053_s12 + $0x364] sm:$0xf] }
  0xbf   : > { %v628_v56 = vmax.f32 %v624_v54, 0.0  ;;  %v2497_v54 = vor.u32 %v2878_v45, %v2496_v44  ;;  %v2915_v44 = vld [vmem:[%s3053_s12 + $0x3f4] sm:$0xf]  ;;  %v2682_v45 = vld [vmem:[%s3053_s12 + $0x3f8] sm:$0xf0] }
  0xc0   : > { %v2594_v53 = vld [vmem:[%s3053_s12 + $0x368] sm:$0xf0]  ;;  %v2648_v32 = vld [vmem:[%s3053_s12 + $0x3b0] sm:$0xf]  ;;  %v2908_v33 = vld [vmem:[%s3053_s12 + $0x3b4] sm:$0xf0] }
  0xc1   : > { %630 = vst [vmem:[#allocation3] sm:$0xff] %v628_v56  ;;  %v2907_v34 = vld [vmem:[%s3053_s12 + $0x3b4] sm:$0xf]  ;;  %v2650_v35 = vld [vmem:[%s3053_s12 + $0x3b8] sm:$0xf0] }
  0xc2   : > { %v611_v59 = vpop.f32.mrf.mxu2 }
  0xc3   : > { %v612_v60 = vadd.f32 %v611_v59, %v598_v58  ;;  %v625_v61 = vpop.f32.mrf.mxu3  ;;  %v2876_v58 = vld [vmem:[%s3053_s12 + $0x2b4] sm:$0xf0] }
  0xc4   : > { %v2489_v4 = vor.u32 %v2876_v58, %v2488_v57  ;;  %v2672_v57 = vld [vmem:[%s3053_s12 + $0x3e0] sm:$0xf]  ;;  %v2914_v58 = vld [vmem:[%s3053_s12 + $0x3e4] sm:$0xf0] }
  0xc5   : > { %v626_v62 = vadd.f32 %v625_v61, %v612_v60  ;;  %v2875_v60 = vld [vmem:[%s3053_s12 + $0x2b4] sm:$0xf]  ;;  %v2490_v61 = vld [vmem:[%s3053_s12 + $0x2b8] sm:$0xf0] }
  0xc7   : > { %v629_v5 = vmax.f32 %v626_v62, 0.0 }
  0xc8   : > { %v633_v8 = vld [vmem:[#allocation3] sm:$0x3]  ;;  %v764_v9 = vld [vmem:[#allocation3 + $0x2] sm:$0x3]  ;;  %v895_v56 = vld [vmem:[#allocation3 + $0x4] sm:$0x3] }
  0xc9   : > { %631 = vst [vmem:[#allocation3 + $0x8] sm:$0xff] %v629_v5  ;;  %v634_v10 = vpack.c.bf16 %v633_v8, %v633_v8  ;;  %v765_v11 = vpack.c.bf16 %v764_v9, %v764_v9  ;;  %v1026_v59 = vld [vmem:[#allocation3 + $0x6] sm:$0x3]  ;;  %v896_v62 = vpack.c.bf16 %v895_v56, %v895_v56  ;;  %v2493_v5 = vor.u32 %v2875_v60, %v2490_v61  ;;  %v2480_v8 = vld [vmem:[%s3053_s12 + $0x2a0] sm:$0xf] }
  0xca   : > { %v1027_v3 = vpack.c.bf16 %v1026_v59, %v1026_v59  ;;  %v2874_v9 = vld [vmem:[%s3053_s12 + $0x2a4] sm:$0xf0]  ;;  %v2913_v60 = vld [vmem:[%s3053_s12 + $0x3e4] sm:$0xf]  ;;  %v2674_v61 = vld [vmem:[%s3053_s12 + $0x3e8] sm:$0xf0] }
  0xcb   : > { %739 = vmatmul.bf16.vlgmr.msrb.gmra.mxu0 %v634_v10  ;;  %752 = vmatmul.bf16.vlgmr.msrb.gmra.mxu1 %v634_v10  ;;  %v2873_v10 = vld [vmem:[%s3053_s12 + $0x2a4] sm:$0xf] }
  0xcc   : > { %871 = vmatmul.bf16.vlgmr.msrb.gmra.mxu2 %v765_v11  ;;  %884 = vmatmul.bf16.vlgmr.msrb.gmra.mxu3 %v765_v11  ;;  %v2482_v11 = vld [vmem:[%s3053_s12 + $0x2a8] sm:$0xf0] }
  0xcd   : > { %1256 = vmatpush.bf16.msrb.mxu0 %v2441_v12  ;;  %1269 = vmatpush.bf16.msrb.mxu1 %v2445_v13  ;;  %v2401_v12 = vor.u32 %v2858_v2, %v2400_v1  ;;  %v2405_v13 = vor.u32 %v2857_v6, %v2402_v7  ;;  %v2584_v1 = vld [vmem:[%s3053_s12 + $0x350] sm:$0xf]  ;;  %v2896_v2 = vld [vmem:[%s3053_s12 + $0x354] sm:$0xf0]  ;;  %v2895_v6 = vld [vmem:[%s3053_s12 + $0x354] sm:$0xf] }
  0xce   : > { %1387 = vmatpush.bf16.msrb.mxu2 %v2521_v16  ;;  %1400 = vmatpush.bf16.msrb.mxu3 %v2525_v17  ;;  %v2481_v16 = vor.u32 %v2874_v9, %v2480_v8  ;;  %v2485_v17 = vor.u32 %v2873_v10, %v2482_v11  ;;  %v2586_v7 = vld [vmem:[%s3053_s12 + $0x358] sm:$0xf0]  ;;  %v2664_v8 = vld [vmem:[%s3053_s12 + $0x3d0] sm:$0xf]  ;;  %v2912_v9 = vld [vmem:[%s3053_s12 + $0x3d4] sm:$0xf0] }
  0xcf   : > { %v2911_v10 = vld [vmem:[%s3053_s12 + $0x3d4] sm:$0xf]  ;;  %v2666_v11 = vld [vmem:[%s3053_s12 + $0x3d8] sm:$0xf0] }
  0xd0   : > { %v1157_v56 = vld [vmem:[#allocation3 + $0x8] sm:$0x3]  ;;  %v1288_v59 = vld [vmem:[#allocation3 + $0xa] sm:$0x3] }
  0xd1   : > { %1257 = vmatpush.bf16.msrb.mxu0 %v2433_v24  ;;  %1270 = vmatpush.bf16.msrb.mxu1 %v2437_v25  ;;  %v2384_v24 = vld [vmem:[%s3053_s12 + $0x200] sm:$0xf]  ;;  %v2393_v25 = vor.u32 %v2856_v15, %v2392_v14  ;;  %v2894_v15 = vld [vmem:[%s3053_s12 + $0x344] sm:$0xf0] }
  0xd2   : > { %1388 = vmatpush.bf16.msrb.mxu2 %v2513_v28  ;;  %1401 = vmatpush.bf16.msrb.mxu3 %v2517_v29  ;;  %v2853_v28 = vld [vmem:[%s3053_s12 + $0x204] sm:$0xf]  ;;  %v2386_v29 = vld [vmem:[%s3053_s12 + $0x208] sm:$0xf0]  ;;  %v2576_v14 = vld [vmem:[%s3053_s12 + $0x340] sm:$0xf] }
  0xd3   : > { %v2389_v42 = vor.u32 %v2853_v28, %v2386_v29  ;;  %v2657_v28 = vor.u32 %v2910_v21, %v2656_v20  ;;  %v2661_v29 = vor.u32 %v2909_v22, %v2658_v23 }
  0xd5   : > { %1258 = vmatpush.bf16.msrb.mxu0 %v2425_v36  ;;  %1271 = vmatpush.bf16.msrb.mxu1 %v2429_v37  ;;  %v2600_v36 = vld [vmem:[%s3053_s12 + $0x370] sm:$0xf]  ;;  %v2900_v37 = vld [vmem:[%s3053_s12 + $0x374] sm:$0xf0] }
  0xd6   : > { %1389 = vmatpush.bf16.msrb.mxu2 %v2505_v40  ;;  %1402 = vmatpush.bf16.msrb.mxu3 %v2509_v41  ;;  %v2680_v40 = vld [vmem:[%s3053_s12 + $0x3f0] sm:$0xf]  ;;  %v2385_v41 = vor.u32 %v2854_v27, %v2384_v24  ;;  %v2577_v24 = vor.u32 %v2894_v15, %v2576_v14  ;;  %v2892_v27 = vld [vmem:[%s3053_s12 + $0x334] sm:$0xf0] }
  0xd9   : > { %1259 = vmatpush.bf16.msrb.mxu0 %v2417_v49  ;;  %1272 = vmatpush.bf16.msrb.mxu1 %v2421_v50  ;;  %v2601_v49 = vor.u32 %v2900_v37, %v2600_v36  ;;  %v2605_v50 = vor.u32 %v2899_v38, %v2602_v39  ;;  %v2560_v38 = vld [vmem:[%s3053_s12 + $0x320] sm:$0xf]  ;;  %v2890_v39 = vld [vmem:[%s3053_s12 + $0x324] sm:$0xf0] }
  0xda   : > { %1390 = vmatpush.bf16.msrb.mxu2 %v2497_v54  ;;  %1403 = vmatpush.bf16.msrb.mxu3 %v2501_v55  ;;  %v2681_v54 = vor.u32 %v2916_v43, %v2680_v40  ;;  %v2685_v55 = vor.u32 %v2915_v44, %v2682_v45  ;;  %v2649_v40 = vor.u32 %v2908_v33, %v2648_v32  ;;  %v2562_v43 = vld [vmem:[%s3053_s12 + $0x328] sm:$0xf0]  ;;  %v2640_v44 = vld [vmem:[%s3053_s12 + $0x3a0] sm:$0xf]  ;;  %v2906_v45 = vld [vmem:[%s3053_s12 + $0x3a4] sm:$0xf0] }
  0xdb   : > { %1002 = vmatmul.bf16.vlgmr.msra.gmra.mxu0 %v896_v62  ;;  %1015 = vmatmul.bf16.vlgmr.msra.gmra.mxu1 %v896_v62  ;;  %v1158_v62 = vpack.c.bf16 %v1157_v56, %v1157_v56  ;;  %v2632_v56 = vld [vmem:[%s3053_s12 + $0x390] sm:$0xf] }
  0xdc   : > { %1133 = vmatmul.bf16.vlgmr.msra.gmra.mxu2 %v1027_v3  ;;  %1146 = vmatmul.bf16.vlgmr.msra.gmra.mxu3 %v1027_v3  ;;  %v1289_v3 = vpack.c.bf16 %v1288_v59, %v1288_v59  ;;  %v2634_v59 = vld [vmem:[%s3053_s12 + $0x398] sm:$0xf0] }
  0xdd   : > { %1260 = vmatpush.bf16.msrb.mxu0 %v2409_v63  ;;  %1273 = vmatpush.bf16.msrb.mxu1 %v2413_v0  ;;  %v2593_v63 = vor.u32 %v2898_v51, %v2592_v48  ;;  %v2597_v0 = vor.u32 %v2897_v52, %v2594_v53  ;;  %v2561_v48 = vor.u32 %v2890_v39, %v2560_v38  ;;  %v2888_v51 = vld [vmem:[%s3053_s12 + $0x314] sm:$0xf0] }
  0xde   : > { %1391 = vmatpush.bf16.msrb.mxu2 %v2489_v4  ;;  %1404 = vmatpush.bf16.msrb.mxu3 %v2493_v5  ;;  %v2673_v4 = vor.u32 %v2914_v58, %v2672_v57  ;;  %v2677_v5 = vor.u32 %v2913_v60, %v2674_v61  ;;  %v2641_v52 = vor.u32 %v2906_v45, %v2640_v44  ;;  %v2904_v57 = vld [vmem:[%s3053_s12 + $0x394] sm:$0xf0]  ;;  %v2903_v58 = vld [vmem:[%s3053_s12 + $0x394] sm:$0xf] }
  0xe1   : > { %1261 = vmatpush.bf16.msrb.mxu0 %v2401_v12  ;;  %1274 = vmatpush.bf16.msrb.mxu1 %v2405_v13  ;;  %v2585_v12 = vor.u32 %v2896_v2, %v2584_v1  ;;  %v2589_v13 = vor.u32 %v2895_v6, %v2586_v7  ;;  %v2637_v1 = vor.u32 %v2903_v58, %v2634_v59  ;;  %v2885_v2 = vld [vmem:[%s3053_s12 + $0x304] sm:$0xf]  ;;  %v2626_v7 = vld [vmem:[%s3053_s12 + $0x388] sm:$0xf0] }
  0xe2   : > { %1392 = vmatpush.bf16.msrb.mxu2 %v2481_v16  ;;  %1405 = vmatpush.bf16.msrb.mxu3 %v2485_v17  ;;  %v2665_v16 = vor.u32 %v2912_v9, %v2664_v8  ;;  %v2669_v17 = vor.u32 %v2911_v10, %v2666_v11  ;;  %v2901_v6 = vld [vmem:[%s3053_s12 + $0x384] sm:$0xf] }
  0xe3   : > { %v2629_v11 = vor.u32 %v2901_v6, %v2626_v7 }
  0xe5   : > { %1262 = vmatpush.bf16.msrb.mxu0 %v2393_v25  ;;  %1275 = vmatpush.bf16.msrb.mxu1 %v2397_v26  ;;  %v2581_v25 = vor.u32 %v2893_v18, %v2578_v19  ;;  %v2568_v26 = vld [vmem:[%s3053_s12 + $0x330] sm:$0xf] }
  0xe6   : > { %1393 = vmatpush.bf16.msrb.mxu2 %v2473_v30  ;;  %1406 = vmatpush.bf16.msrb.mxu3 %v2477_v31  ;;  %v2891_v30 = vld [vmem:[%s3053_s12 + $0x334] sm:$0xf]  ;;  %v2570_v31 = vld [vmem:[%s3053_s12 + $0x338] sm:$0xf0]  ;;  %v2569_v36 = vor.u32 %v2892_v27, %v2568_v26 }
  0xe7   : > { %v2573_v37 = vor.u32 %v2891_v30, %v2570_v31 }
  0xe9   : > { %1263 = vmatpush.bf16.msrb.mxu0 %v2385_v41  ;;  %1276 = vmatpush.bf16.msrb.mxu1 %v2389_v42  ;;  %v2653_v41 = vor.u32 %v2907_v34, %v2650_v35  ;;  %v2889_v42 = vld [vmem:[%s3053_s12 + $0x324] sm:$0xf] }
  0xea   : > { %1394 = vmatpush.bf16.msrb.mxu2 %v2465_v46  ;;  %1407 = vmatpush.bf16.msrb.mxu3 %v2469_v47  ;;  %v2905_v46 = vld [vmem:[%s3053_s12 + $0x3a4] sm:$0xf]  ;;  %v2642_v47 = vld [vmem:[%s3053_s12 + $0x3a8] sm:$0xf0] }
  0xeb   : > { %v2645_v53 = vor.u32 %v2905_v46, %v2642_v47 }
  0xec   : > { %1264 = vmatmul.bf16.vlgmr.msrb.gmra.mxu0 %v1158_v62  ;;  %1277 = vmatmul.bf16.vlgmr.msrb.gmra.mxu1 %v1158_v62  ;;  %v2544_v62 = vld [vmem:[%s3053_s12 + $0x300] sm:$0xf] }
  0xed   : > { %1518 = vmatpush.bf16.msra.mxu0 %v2601_v49  ;;  %1531 = vmatpush.bf16.msra.mxu1 %v2605_v50  ;;  %v2565_v49 = vor.u32 %v2889_v42, %v2562_v43  ;;  %v2552_v50 = vld [vmem:[%s3053_s12 + $0x310] sm:$0xf]  ;;  %v632_v42 = vld [vmem:[#allocation2] sm:$0xf] }
  0xee   : > { %1649 = vmatpush.bf16.msra.mxu2 %v2681_v54  ;;  %1662 = vmatpush.bf16.msra.mxu3 %v2685_v55  ;;  %v2887_v54 = vld [vmem:[%s3053_s12 + $0x314] sm:$0xf]  ;;  %v2554_v55 = vld [vmem:[%s3053_s12 + $0x318] sm:$0xf0]  ;;  %v2553_v60 = vor.u32 %v2888_v51, %v2552_v50 }
  0xef   : > { %1395 = vmatmul.bf16.vlgmr.msrb.gmra.mxu2 %v1289_v3  ;;  %1408 = vmatmul.bf16.vlgmr.msrb.gmra.mxu3 %v1289_v3  ;;  %v2557_v61 = vor.u32 %v2887_v54, %v2554_v55  ;;  %v2546_v3 = vld [vmem:[%s3053_s12 + $0x308] sm:$0xf0] }
  0xf0   : > { %v2549_v9 = vor.u32 %v2885_v2, %v2546_v3 }
  0xf1   : > { %1519 = vmatpush.bf16.msra.mxu0 %v2593_v63  ;;  %1532 = vmatpush.bf16.msra.mxu1 %v2597_v0  ;;  %v2886_v63 = vld [vmem:[%s3053_s12 + $0x304] sm:$0xf0]  ;;  %v2633_v0 = vor.u32 %v2904_v57, %v2632_v56 }
  0xf2   : > { %1650 = vmatpush.bf16.msra.mxu2 %v2673_v4  ;;  %1663 = vmatpush.bf16.msra.mxu3 %v2677_v5  ;;  %v2624_v4 = vld [vmem:[%s3053_s12 + $0x380] sm:$0xf]  ;;  %v2902_v5 = vld [vmem:[%s3053_s12 + $0x384] sm:$0xf0]  ;;  %v2545_v8 = vor.u32 %v2886_v63, %v2544_v62 }
  0xf3   : > { %v2625_v10 = vor.u32 %v2902_v5, %v2624_v4 }
  0xf5   : > { %1520 = vmatpush.bf16.msra.mxu0 %v2585_v12  ;;  %1533 = vmatpush.bf16.msra.mxu1 %v2589_v13  ;;  %v1419_v12 = vld [vmem:[#allocation3 + $0xc] sm:$0x3]  ;;  %v1550_v13 = vld [vmem:[#allocation3 + $0xe] sm:$0x3] }
  0xf6   : > { %1651 = vmatpush.bf16.msra.mxu2 %v2665_v16  ;;  %1664 = vmatpush.bf16.msra.mxu3 %v2669_v17  ;;  %v1420_v14 = vpack.c.bf16 %v1419_v12, %v1419_v12  ;;  %v1551_v15 = vpack.c.bf16 %v1550_v13, %v1550_v13 }
  0xf9   : > { %1521 = vmatpush.bf16.msra.mxu0 %v2577_v24  ;;  %1534 = vmatpush.bf16.msra.mxu1 %v2581_v25 }
  0xfa   : > { %1652 = vmatpush.bf16.msra.mxu2 %v2657_v28  ;;  %1665 = vmatpush.bf16.msra.mxu3 %v2661_v29 }
  0xfd   : > { %1522 = vmatpush.bf16.msra.mxu0 %v2569_v36  ;;  %1535 = vmatpush.bf16.msra.mxu1 %v2573_v37 }
  0xfe   : > { %1653 = vmatpush.bf16.msra.mxu2 %v2649_v40  ;;  %1666 = vmatpush.bf16.msra.mxu3 %v2653_v41 }
 0x101   : > { %1523 = vmatpush.bf16.msra.mxu0 %v2561_v48  ;;  %1536 = vmatpush.bf16.msra.mxu1 %v2565_v49 }
 0x102   : > { %1654 = vmatpush.bf16.msra.mxu2 %v2641_v52  ;;  %1667 = vmatpush.bf16.msra.mxu3 %v2645_v53 }
 0x105   : > { %1524 = vmatpush.bf16.msra.mxu0 %v2553_v60  ;;  %1537 = vmatpush.bf16.msra.mxu1 %v2557_v61 }
 0x106   : > { %1655 = vmatpush.bf16.msra.mxu2 %v2633_v0  ;;  %1668 = vmatpush.bf16.msra.mxu3 %v2637_v1 }
 0x109   : > { %1525 = vmatpush.bf16.msra.mxu0 %v2545_v8  ;;  %1538 = vmatpush.bf16.msra.mxu1 %v2549_v9 }
 0x10a   : > { %1656 = vmatpush.bf16.msra.mxu2 %v2625_v10  ;;  %1669 = vmatpush.bf16.msra.mxu3 %v2629_v11 }
 0x10c   : > { %1526 = vmatmul.bf16.vlgmr.msra.gmra.mxu0 %v1420_v14  ;;  %1539 = vmatmul.bf16.vlgmr.msra.gmra.mxu1 %v1420_v14 }
 0x10d   : > { %1657 = vmatmul.bf16.vlgmr.msra.gmra.mxu2 %v1551_v15  ;;  %1670 = vmatmul.bf16.vlgmr.msra.gmra.mxu3 %v1551_v15 }
 0x148   : > { %v740_v16 = vpop.f32.mrf.mxu0  ;;  %v753_v17 = vpop.f32.mrf.mxu1 }
 0x149   : > { %v759_v40 = vrot.slane %v753_v17, 6 }
 0x14b   : > { %v761_v43 = vsel %vm760_vm0, %v740_v16, %v759_v40 }
 0x14c   : > { %v763_v47 = vadd.f32 %v761_v43, %v632_v42 }
 0x14f   : > { %v872_v18 = vpop.f32.mrf.mxu2  ;;  %v885_v19 = vpop.f32.mrf.mxu3 }
 0x150   : > { %v742_v20 = vpop.f32.mrf.mxu0  ;;  %v755_v21 = vpop.f32.mrf.mxu1  ;;  %v891_v41 = vrot.slane %v885_v19, 6 }
 0x152   : > { %v892_v45 = vsel %vm760_vm0, %v872_v18, %v891_v41 }
 0x153   : > { %v894_v50 = vadd.f32 %v892_v45, %v763_v47 }
 0x157   : > { %v874_v22 = vpop.f32.mrf.mxu2  ;;  %v887_v23 = vpop.f32.mrf.mxu3 }
 0x158   : > { %v1003_v24 = vpop.f32.mrf.mxu0  ;;  %v1016_v25 = vpop.f32.mrf.mxu1 }
 0x159   : > { %v1022_v44 = vrot.slane %v1016_v25, 6 }
 0x15b   : > { %v1023_v48 = vsel %vm760_vm0, %v1003_v24, %v1022_v44 }
 0x15c   : > { %v1025_v55 = vadd.f32 %v1023_v48, %v894_v50 }
 0x15f   : > { %v1134_v26 = vpop.f32.mrf.mxu2  ;;  %v1147_v27 = vpop.f32.mrf.mxu3 }
 0x160   : > { %v1005_v28 = vpop.f32.mrf.mxu0  ;;  %v1018_v29 = vpop.f32.mrf.mxu1  ;;  %v1153_v46 = vrot.slane %v1147_v27, 6 }
 0x162   : > { %v1154_v51 = vsel %vm760_vm0, %v1134_v26, %v1153_v46 }
 0x163   : > { %v1156_v58 = vadd.f32 %v1154_v51, %v1025_v55 }
 0x167   : > { %v1136_v30 = vpop.f32.mrf.mxu2  ;;  %v1149_v31 = vpop.f32.mrf.mxu3 }
 0x169   : > { %v1265_v32 = vpop.f32.mrf.mxu0  ;;  %v1278_v33 = vpop.f32.mrf.mxu1 }
 0x16a   : > { %v1284_v49 = vrot.slane %v1278_v33, 6 }
 0x16c   : > { %v1285_v56 = vsel %vm760_vm0, %v1265_v32, %v1284_v49 }
 0x16d   : > { %v1287_v60 = vadd.f32 %v1285_v56, %v1156_v58 }
 0x171   : > { %v1267_v36 = vpop.f32.mrf.mxu0  ;;  %v1280_v37 = vpop.f32.mrf.mxu1 }
 0x172   : > { %v1396_v34 = vpop.f32.mrf.mxu2  ;;  %v1409_v35 = vpop.f32.mrf.mxu3 }
 0x173   : > { %v1415_v52 = vrot.slane %v1409_v35, 6 }
 0x175   : > { %v1416_v59 = vsel %vm760_vm0, %v1396_v34, %v1415_v52 }
 0x176   : > { %v1418_v62 = vadd.f32 %v1416_v59, %v1287_v60 }
 0x17a   : > { %v1398_v38 = vpop.f32.mrf.mxu2  ;;  %v1411_v39 = vpop.f32.mrf.mxu3 }
 0x189   : > { %v1527_v53 = vpop.f32.mrf.mxu0  ;;  %v1540_v54 = vpop.f32.mrf.mxu1 }
 0x18a   : > { %v1546_v57 = vrot.slane %v1540_v54, 6 }
 0x18c   : > { %v1547_v61 = vsel %vm760_vm0, %v1527_v53, %v1546_v57 }
 0x18d   : > { %v1549_v4 = vadd.f32 %v1547_v61, %v1418_v62 }
 0x190   : > { %v1658_v63 = vpop.f32.mrf.mxu2  ;;  %v1671_v0 = vpop.f32.mrf.mxu3 }
 0x191   : > { %v1677_v1 = vrot.slane %v1671_v0, 6  ;;  %v1529_v2 = vpop.f32.mrf.mxu0  ;;  %v1542_v3 = vpop.f32.mrf.mxu1 }
 0x193   : > { %v1678_v5 = vsel %vm760_vm0, %v1658_v63, %v1677_v1 }
 0x194   : > { %v1680_v6 = vadd.f32 %v1678_v5, %v1549_v4  ;;  %1685 = sbr.rel (%p2686_p6) target bundleno = 576 (0x240), region = 56 }
 0x196   : > { %1681 = vst [vmem:[#allocation2] sm:$0xf] %v1680_v6 }
 0x198   : > { %v1660_v7 = vpop.f32.mrf.mxu2  ;;  %v1673_v8 = vpop.f32.mrf.mxu3 }
 0x199   : > { %v2924_v9 = vld [vmem:[%s3495_s5 + $0x38] sm:$0xff]  ;;  %v2923_v11 = vld [vmem:[%s3495_s5 + $0x30] sm:$0xff]  ;;  %v1686_v13 = vld [vmem:[%s3494_s4] sm:$0x3]  ;;  %vm1861_vm1 = vcmask 74752  }
 0x19a   : > { %v2932_v10 = vld [vmem:[%s3495_s5 + $0x78] sm:$0xff]  ;;  %1835 = vmatpush.bf16.msra.mxu0 %v2924_v9  ;;  %v2931_v12 = vld [vmem:[%s3495_s5 + $0x70] sm:$0xff]  ;;  %v2922_v14 = vld [vmem:[%s3495_s5 + $0x28] sm:$0xff]  ;;  %v1688_v16 = vperm.slane %v1686_v13, 0  ;;  %v1689_v17 = vperm.slane %v1686_v13, 1 }
 0x19b   : > { %1848 = vmatpush.bf16.msra.mxu1 %v2932_v10  ;;  %v2930_v15 = vld [vmem:[%s3495_s5 + $0x68] sm:$0xff]  ;;  %v2921_v19 = vld [vmem:[%s3495_s5 + $0x20] sm:$0xff]  ;;  %v2920_v24 = vld [vmem:[%s3495_s5 + $0x18] sm:$0xff] }
 0x19c   : > { %v1690_v18 = vrot.slane %v1689_v17, 6  ;;  %v2929_v20 = vld [vmem:[%s3495_s5 + $0x60] sm:$0xff]  ;;  %v2928_v25 = vld [vmem:[%s3495_s5 + $0x58] sm:$0xff]  ;;  %v2919_v26 = vld [vmem:[%s3495_s5 + $0x10] sm:$0xff] }
 0x19d   : > { %v2927_v27 = vld [vmem:[%s3495_s5 + $0x50] sm:$0xff]  ;;  %v2918_v28 = vld [vmem:[%s3495_s5 + $0x8] sm:$0xff]  ;;  %v2917_v30 = vld [vmem:[%s3495_s5] sm:$0xff] }
 0x19e   : > { %1836 = vmatpush.bf16.msra.mxu0 %v2923_v11  ;;  %v1691_v21 = vsel %vm760_vm0, %v1688_v16, %v1690_v18  ;;  %v2926_v29 = vld [vmem:[%s3495_s5 + $0x48] sm:$0xff]  ;;  %v2925_v31 = vld [vmem:[%s3495_s5 + $0x40] sm:$0xff] }
 0x19f   : > { %1849 = vmatpush.bf16.msra.mxu1 %v2931_v12  ;;  %v1693_v22 = vadd.f32 %v1691_v21, %v1680_v6  ;;  %v2950_v36 = vld [vmem:[%s3496_s6] ss:$0 sm:$0xff] }
 0x1a1   : > { %v1694_v23 = vmax.f32 %v1693_v22, 0.0 }
 0x1a2   : > { %1837 = vmatpush.bf16.msra.mxu0 %v2922_v14 }
 0x1a3   : > { %1850 = vmatpush.bf16.msra.mxu1 %v2930_v15  ;;  %1696 = vst [vmem:[#allocation1] ss:$4 sm:$0xff] %v1694_v23 }
 0x1a6   : > { %1838 = vmatpush.bf16.msra.mxu0 %v2921_v19 }
 0x1a7   : > { %1851 = vmatpush.bf16.msra.mxu1 %v2929_v20 }
 0x1aa   : > { %1839 = vmatpush.bf16.msra.mxu0 %v2920_v24  ;;  %v1697_v32 = vld.sshfl [vmem:[#allocation1] sm:$0xff pattern:$0x73625140]  ;;  %v1698_v33 = vld.sshfl [vmem:[#allocation1 + $0x8] sm:$0xff pattern:$0x73625140] }
 0x1ab   : > { %1852 = vmatpush.bf16.msra.mxu1 %v2928_v25  ;;  %v1701_v34 = vpack.c.bf16 %v1697_v32, %v1697_v32  ;;  %v1702_v35 = vpack.c.bf16 %v1698_v33, %v1698_v33 }
 0x1ae   : > { %1840 = vmatpush.bf16.msra.mxu0 %v2919_v26 }
 0x1af   : > { %1853 = vmatpush.bf16.msra.mxu1 %v2927_v27 }
 0x1b2   : > { %1841 = vmatpush.bf16.msra.mxu0 %v2918_v28 }
 0x1b3   : > { %1854 = vmatpush.bf16.msra.mxu1 %v2926_v29 }
 0x1b6   : > { %1842 = vmatpush.bf16.msra.mxu0 %v2917_v30 }
 0x1b7   : > { %1855 = vmatpush.bf16.msra.mxu1 %v2925_v31 }
 0x1b9   : > { %1843 = vmatmul.bf16.vlgmr.msra.gmra.mxu0 %v1701_v34 }
 0x1ba   : > { %1856 = vmatmul.bf16.vlgmr.msra.gmra.mxu1 %v1702_v35 }
 0x236   : > { %v1844_v37 = vpop.f32.mrf.mxu0 }
 0x237   : > { %v1857_v38 = vpop.f32.mrf.mxu1  ;;  %v1845_v39 = vadd.f32 %v2950_v36, %v1844_v37 }
 0x239   : > { %v1858_v40 = vadd.f32 %v1857_v38, %v1845_v39 }
 0x23b   : > { %1862 = vst.msk [vmem:[#allocation4] sm:$0x3] %vm1861_vm1, %v1858_v40 }
 0x23e   : > { %v1846_v41 = vpop.f32.mrf.mxu0 }
 0x23f   : > { %v1859_v42 = vpop.f32.mrf.mxu1 }
 0x240 PF: > { %p2937_p7 = scmp.eq.s32.totalorder %s3039_s25, 4  ;;  %s2992_s16 = smov [#allocation4]  }
 0x241   : > { %s1869_s17 = sshll.u32 %s2992_s16, 4  ;;  %s1871_s8 = sshll.u32 %s3497_s7, 4  ;;  %s1870_s17 = int_to_ptr.vmem [resolvable:$true] %s1869_s17  ;;  %s1872_s8 = int_to_ptr.hbm [resolvable:$true] %s1871_s8 }
 0x242   : > { %2934 = dma.vmem_to_hbm [thread:$0]  (%p2937_p7), %s1870_s17, 32, %s1872_s8, [#allocation5]  }
 0x243   : > { %2984 = dma.done.wait (%p2937_p7), [#allocation5], 32  }
 0x244   : > { %2986 = vsyncadd (%p2937_p7), [#allocation5], 4294967264 }
 0x245 PF: > { %s18_s24 = sadd.s32 1, %s2989_s24  }
 0x246   : > { %p15_p8 = scmp.ge.s32.totalorder %s18_s24, 7  }
 0x248   :  { %17 = sbr.rel (!%p15_p8) target bundleno = 1 (0x1), region = 93 }
 0x24d   :  { %1885 = vsyncpa [#allocation5], 1 }
 0x24e   :  { %1887 = vsyncpa [#allocation5 + $0x1], 1 }

</bundles_post_ra>
